<compile_context>
chip_gen: v6e
topology: v6e:2x2x1
jax: 0.10.0
libtpu: 0.0.40
codegen_flags: <defaults>
</compile_context>

<pallas_src>
import functools
import numpy as np
import jax
import jax.numpy as jnp
from jax.experimental import pallas as pl
from jax.experimental.pallas import tpu as pltpu


# ----------------------------------------------------------------------------
# schedule buffers (mirrors the register_buffer math in __init__), kept as numpy
# so they can be baked into the unrolled kernel as per-step scalar constants.
# ----------------------------------------------------------------------------
def cosine_beta_schedule(timesteps, s=0.008):
    steps = timesteps + 1
    x = np.linspace(0, steps, steps)
    alphas_cumprod = np.cos(((x / steps) + s) / (1 + s) * np.pi * 0.5) ** 2
    alphas_cumprod = alphas_cumprod / alphas_cumprod[0]
    betas = 1.0 - (alphas_cumprod[1:] / alphas_cumprod[:-1])
    return np.clip(betas, 0.0, 0.999)


def make_schedule(n_timesteps):
    betas = cosine_beta_schedule(n_timesteps).astype(np.float64)
    alphas = 1.0 - betas
    alphas_cumprod = np.cumprod(alphas, axis=0)
    alphas_cumprod_prev = np.concatenate([np.ones(1), alphas_cumprod[:-1]])
    posterior_variance = betas * (1.0 - alphas_cumprod_prev) / (1.0 - alphas_cumprod)
    posterior_log_variance_clipped = np.log(np.clip(posterior_variance, 1e-20, None))
    t_idx = np.arange(n_timesteps)
    nonzero_mask = (t_idx != 0).astype(np.float64)            # (1 - (t == 0))
    sqrt_recip = np.sqrt(1.0 / alphas_cumprod)
    sqrt_recipm1 = np.sqrt(1.0 / alphas_cumprod - 1.0)
    pmc1 = betas * np.sqrt(alphas_cumprod_prev) / (1.0 - alphas_cumprod)
    pmc2 = (1.0 - alphas_cumprod_prev) * np.sqrt(alphas) / (1.0 - alphas_cumprod)
    return dict(
        sqrt_recip_alphas_cumprod=sqrt_recip.astype(np.float32),
        sqrt_recipm1_alphas_cumprod=sqrt_recipm1.astype(np.float32),
        posterior_mean_coef1=pmc1.astype(np.float32),
        posterior_mean_coef2=pmc2.astype(np.float32),
        # merged constants for the predict_epsilon & !clip_denoised fast path:
        #   mean = (pmc1*sqrt_recip + pmc2) * x  -  (pmc1*sqrt_recipm1) * eps
        merged_x_coef=(pmc1 * sqrt_recip + pmc2).astype(np.float32),
        merged_eps_coef=(pmc1 * sqrt_recipm1).astype(np.float32),
        # std with (t==0) mask, exp(0.5*logvar) and the 0.5 noise factor all folded in
        posterior_std_masked=(0.5 * nonzero_mask
                              * np.exp(0.5 * posterior_log_variance_clipped)).astype(np.float32),
    )


# ----------------------------------------------------------------------------
# single fused kernel: whole p_sample_loop, x resident in VMEM for all steps.
# Layout: x / cond / eps are (T, BH)  (batch*horizon on the lane dim).
# Per unrolled step t:
#   eps   = w2^T @ tanh(w1^T @ x + (b1+temb[t]))          (2 MXU matmuls + EUP tanh)
#   x     = cx[t]*x - ce[t]*eps  (+ prescaled noise[t])    (merged posterior update)
#   x     = where(static_mask, cond, x)                    (apply_conditioning, 1 vsel)
# ----------------------------------------------------------------------------
def _diffusion_loop_kernel(cond_ref, w1t_ref, b1t_ref, w2t_ref, b2t_ref, noise_ref,
                           out_ref, *, schedule, n_timesteps, horizon,
                           action_reward_dim, cond_length,
                           clip_denoised, predict_epsilon):
    cond = cond_ref[...]            # (T, BH) conditioning values (0 where unconditioned)
    w1t = w1t_ref[...]              # (Hid, T)
    w2t = w2t_ref[...]              # (T, Hid)
    b2t = b2t_ref[...]              # (T, 1)
    T, BH = cond.shape

    # compile-time-static conditioning mask, rebuilt in-kernel (no HBM input, no per-step cmp)
    row = jax.lax.broadcasted_iota(jnp.int32, (T, BH), 0)
    col = jax.lax.broadcasted_iota(jnp.int32, (T, BH), 1)
    m = jnp.logical_and(row >= action_reward_dim, (col % horizon) < cond_length)

    c_recip = schedule["sqrt_recip_alphas_cumprod"]
    c_recipm1 = schedule["sqrt_recipm1_alphas_cumprod"]
    pmc1 = schedule["posterior_mean_coef1"]
    pmc2 = schedule["posterior_mean_coef2"]
    cx = schedule["merged_x_coef"]
    ce = schedule["merged_eps_coef"]

    # x_T = 0.5 * randn  (already scaled in the wrapper), then apply_conditioning
    x = jnp.where(m, cond, noise_ref[0])

    # fully unrolled reverse-diffusion loop (t is a Python constant per step)
    for step in range(n_timesteps):
        t = n_timesteps - 1 - step

        # ---- synthetic epsilon model (time-conditioned 2-layer MLP) ----
        # TODO(synk): the real module calls an external transformer here.
        b1t = b1t_ref[:, t:t + 1]                              # (Hid, 1) = b1 + temb[t]
        h = jnp.tanh(jnp.dot(w1t, x, preferred_element_type=jnp.float32) + b1t)
        eps = jnp.dot(w2t, h, preferred_element_type=jnp.float32) + b2t

        # ---- fused reverse-diffusion update (coefficients baked as constants) ----
        if predict_epsilon and not clip_denoised:
            mean = float(cx[t]) * x - float(ce[t]) * eps
        else:
            if predict_epsilon:
                x_recon = float(c_recip[t]) * x - float(c_recipm1[t]) * eps
            else:
                x_recon = eps
            if clip_denoised:
                x_recon = jnp.clip(x_recon, -1.0, 1.0)
            mean = float(pmc1[t]) * x_recon + float(pmc2[t]) * x

        if t > 0:
            # noise slab row (n - t) is pre-scaled by 0.5 * exp(0.5 * logvar[t])
            x = mean + noise_ref[step + 1]
        else:
            x = mean                                           # (t==0) mask zeroes the noise

        # ---- re-apply conditioning ----
        x = jnp.where(m, cond, x)

    out_ref[...] = x


# ----------------------------------------------------------------------------
# GaussianDiffusion forward  (conditional_sample -> p_sample_loop)
# ----------------------------------------------------------------------------
class GaussianDiffusionPallas:
    def __init__(self, horizon, observation_dim, action_dim, n_timesteps=16,
                 hidden=32, clip_denoised=False, predict_epsilon=True,
                 returns_condition=False, condition_guidance_w=0.1, seed=0):
        self.horizon = horizon
        self.observation_dim = observation_dim
        self.action_dim = action_dim
        self.transition_dim = observation_dim + action_dim + 1
        self.n_timesteps = int(n_timesteps)
        self.clip_denoised = clip_denoised
        self.predict_epsilon = predict_epsilon
        self.returns_condition = returns_condition
        self.condition_guidance_w = condition_guidance_w
        self.schedule = make_schedule(self.n_timesteps)

        # deterministic synthetic epsilon-model parameters, stored pre-transposed for the
        # (T, BH) lane-major kernel layout, with b1 + temb[t] folded host-side.
        k = jax.random.PRNGKey(seed)
        k1, k2, k3 = jax.random.split(k, 3)
        T, Hid = self.transition_dim, hidden
        w1 = (0.1 * jax.random.normal(k1, (T, Hid))).astype(jnp.float32)
        w2 = (0.1 * jax.random.normal(k2, (Hid, T))).astype(jnp.float32)
        temb = (0.1 * jax.random.normal(k3, (self.n_timesteps, Hid))).astype(jnp.float32)
        b1 = jnp.zeros((1, Hid), jnp.float32)
        b2 = jnp.zeros((1, T), jnp.float32)
        self.model_params = {
            "w1t": jnp.transpose(w1),              # (Hid, T)
            "w2t": jnp.transpose(w2),              # (T, Hid)
            "b1t_all": jnp.transpose(b1 + temb),   # (Hid, n_timesteps); column t = b1 + temb[t]
            "b2t": jnp.transpose(b2),              # (T, 1)
        }
        self._forward = jax.jit(self._forward_impl)

    # ---- jitted implementation ---------------------------------------------
    def _forward_impl(self, cond0, key):
        B = cond0.shape[0]
        H, T = self.horizon, self.transition_dim
        BH = B * H
        ard = self.action_dim + 1
        cond_length = cond0.shape[-2]
        n = self.n_timesteps

        # TODO(synk): apply_conditioning util not shown in source; halfcond semantics assumed:
        # overwrite the observation slice of the first cond_length timesteps.
        cond_full = jnp.zeros((B, H, T), jnp.float32)
        cond_full = cond_full.at[:, :cond_length, ard:].set(cond0.astype(jnp.float32))
        cond_tbh = jnp.transpose(cond_full.reshape(BH, T))     # (T, BH) lane-major

        # one batched normal draw (single XLA RNG kernel), pre-scaled per step:
        #   slab[0]           -> 0.5 * randn              (x_T init)
        #   slab[n - t], t>0  -> 0.5 * exp(0.5*logvar[t]) * randn
        noise = jax.random.normal(key, (n + 1, T, BH), jnp.float32)
        scale = jnp.concatenate([
            jnp.full((1,), 0.5, jnp.float32),
            jnp.asarray(self.schedule["posterior_std_masked"][::-1].copy()),
        ]).reshape(n + 1, 1, 1)
        noise = noise * scale

        kernel = functools.partial(
            _diffusion_loop_kernel,
            schedule=self.schedule,
            n_timesteps=n,
            horizon=H,
            action_reward_dim=ard,
            cond_length=cond_length,
            clip_denoised=self.clip_denoised,
            predict_epsilon=self.predict_epsilon,
        )
        vmem = pl.BlockSpec(memory_space=pltpu.MemorySpace.VMEM)
        p = self.model_params
        x_tbh = pl.pallas_call(
            kernel,
            out_shape=jax.ShapeDtypeStruct((T, BH), jnp.float32),
            in_specs=[vmem, vmem, vmem, vmem, vmem, vmem],
            out_specs=vmem,
        )(cond_tbh, p["w1t"], p["b1t_all"], p["w2t"], p["b2t"], noise)
        return jnp.transpose(x_tbh).reshape(B, H, T)

    # ---- forward = conditional_sample -> p_sample_loop ---------------------
    def forward(self, cond, key):
        # TODO(synk): returns_condition / condition_guidance_w (classifier-free guidance)
        # branch is not implemented; default configuration (returns_condition=False) only.
        cond0 = jnp.asarray(cond[0], jnp.float32)
        return self._forward(cond0, key)


# ----------------------------------------------------------------------------
if __name__ == "__main__":
    B, horizon = 2, 8
    observation_dim, action_dim = 4, 3          # transition_dim = 8
    n_timesteps = 16
    cond_length = 2

    diffusion = GaussianDiffusionPallas(
        horizon=horizon,
        observation_dim=observation_dim,
        action_dim=action_dim,
        n_timesteps=n_timesteps,
        hidden=32,
        seed=0,
    )

    key = jax.random.PRNGKey(0)
    key, kc, ks = jax.random.split(key, 3)
    cond = {0: jax.random.normal(kc, (B, cond_length, observation_dim), jnp.float32)}

    out = diffusion.forward(cond, ks)
    out = jax.block_until_ready(out)

    assert out.shape == (B, horizon, observation_dim + action_dim + 1)
    assert bool(jnp.all(jnp.isfinite(out)))
    # conditioned slots must hold the conditioning values exactly (apply_conditioning)
    assert bool(jnp.allclose(out[:, :cond_length, action_dim + 1:], cond[0], atol=1e-5))
    print("KERNEL_OK")
</pallas_src>

<mosaic_0001>
module attributes {stable_mosaic.version = 11 : i64} {
  func.func @_diffusion_loop_kernel(%arg0: memref<8x16xf32, #tpu.memory_space<vmem>>, %arg1: memref<32x8xf32, #tpu.memory_space<vmem>>, %arg2: memref<32x16xf32, #tpu.memory_space<vmem>>, %arg3: memref<8x32xf32, #tpu.memory_space<vmem>>, %arg4: memref<8x1xf32, #tpu.memory_space<vmem>>, %arg5: memref<17x8x16xf32, #tpu.memory_space<vmem>>, %arg6: memref<8x16xf32, #tpu.memory_space<vmem>>) attributes {dimension_semantics = [], scalar_prefetch = 0 : i64, scratch_operands = 0 : i64, tpu.core_type = #tpu.core_type<tc>} {
    %c0 = arith.constant 0 : index
    %c0_0 = arith.constant 0 : index
    %0 = vector.load %arg0[%c0, %c0_0] : memref<8x16xf32, #tpu.memory_space<vmem>>, vector<8x16xf32>
    %c0_1 = arith.constant 0 : index
    %c0_2 = arith.constant 0 : index
    %1 = vector.load %arg1[%c0_1, %c0_2] : memref<32x8xf32, #tpu.memory_space<vmem>>, vector<32x8xf32>
    %c0_3 = arith.constant 0 : index
    %c0_4 = arith.constant 0 : index
    %2 = vector.load %arg3[%c0_3, %c0_4] : memref<8x32xf32, #tpu.memory_space<vmem>>, vector<8x32xf32>
    %c0_5 = arith.constant 0 : index
    %c0_6 = arith.constant 0 : index
    %3 = vector.load %arg4[%c0_5, %c0_6] : memref<8x1xf32, #tpu.memory_space<vmem>>, vector<8x1xf32>
    %4 = tpu.iota {dimensions = array<i32: 0>} : vector<8x16xi32>
    %5 = tpu.iota {dimensions = array<i32: 1>} : vector<8x16xi32>
    %c4_i32 = arith.constant 4 : i32
    %6 = vector.broadcast %c4_i32 : i32 to vector<8x16xi32>
    %7 = arith.cmpi sge, %4, %6 : vector<8x16xi32>
    %c8_i32 = arith.constant 8 : i32
    %c0_i32 = arith.constant 0 : i32
    %8 = arith.cmpi eq, %c8_i32, %c0_i32 : i32
    %c1_i32 = arith.constant 1 : i32
    %9 = arith.select %8, %c1_i32, %c8_i32 : i32
    %10 = vector.broadcast %9 : i32 to vector<8x16xi32>
    %11 = arith.remsi %5, %10 : vector<8x16xi32>
    %c0_i32_7 = arith.constant 0 : i32
    %12 = vector.broadcast %c0_i32_7 : i32 to vector<8x16xi32>
    %13 = arith.cmpi ne, %11, %12 : vector<8x16xi32>
    %c0_i32_8 = arith.constant 0 : i32
    %14 = vector.broadcast %c0_i32_8 : i32 to vector<8x16xi32>
    %15 = arith.cmpi slt, %11, %14 : vector<8x16xi32>
    %c0_i32_9 = arith.constant 0 : i32
    %16 = arith.cmpi slt, %9, %c0_i32_9 : i32
    %17 = vector.broadcast %16 : i1 to vector<8x16xi1>
    %18 = vector.broadcast %17 : vector<8x16xi1> to vector<8x16xi1>
    %19 = arith.xori %15, %18 : vector<8x16xi1>
    %20 = arith.andi %19, %13 : vector<8x16xi1>
    %21 = vector.broadcast %9 : i32 to vector<8x16xi32>
    %22 = arith.addi %11, %21 : vector<8x16xi32>
    %23 = arith.select %20, %22, %11 : vector<8x16xi1>, vector<8x16xi32>
    %c2_i32 = arith.constant 2 : i32
    %24 = vector.broadcast %c2_i32 : i32 to vector<8x16xi32>
    %25 = arith.cmpi slt, %23, %24 : vector<8x16xi32>
    %26 = arith.andi %7, %25 : vector<8x16xi1>
    %c0_10 = arith.constant 0 : index
    %c0_11 = arith.constant 0 : index
    %c0_12 = arith.constant 0 : index
    %27 = vector.load %arg5[%c0_10, %c0_11, %c0_12] : memref<17x8x16xf32, #tpu.memory_space<vmem>>, vector<1x8x16xf32>
    %28 = vector.shape_cast %27 : vector<1x8x16xf32> to vector<8x16xf32>
    %29 = arith.select %26, %0, %28 : vector<8x16xi1>, vector<8x16xf32>
    %c0_13 = arith.constant 0 : index
    %c15 = arith.constant 15 : index
    %30 = vector.load %arg2[%c0_13, %c15] : memref<32x16xf32, #tpu.memory_space<vmem>>, vector<32x1xf32>
    %cst = arith.constant dense<0.000000e+00> : vector<32x16xf32>
    %31 = tpu.matmul %1, %29, %cst {dimension_numbers = #tpu.dot_dimension_numbers<[1], [0], [0], [1], [0, 0, 1, 1], [], []>} : vector<32x8xf32>, vector<8x16xf32>, vector<32x16xf32> -> vector<32x16xf32>
    %32 = vector.broadcast %30 : vector<32x1xf32> to vector<32x16xf32>
    %33 = arith.addf %31, %32 : vector<32x16xf32>
    %34 = math.tanh %33 : vector<32x16xf32>
    %cst_14 = arith.constant dense<0.000000e+00> : vector<8x16xf32>
    %35 = tpu.matmul %2, %34, %cst_14 {dimension_numbers = #tpu.dot_dimension_numbers<[1], [0], [0], [1], [0, 0, 1, 1], [], []>} : vector<8x32xf32>, vector<32x16xf32>, vector<8x16xf32> -> vector<8x16xf32>
    %36 = vector.broadcast %3 : vector<8x1xf32> to vector<8x16xf32>
    %37 = arith.addf %35, %36 : vector<8x16xf32>
    %cst_15 = arith.constant 31.622776 : f32
    %38 = vector.broadcast %cst_15 : f32 to vector<8x16xf32>
    %39 = arith.mulf %38, %29 : vector<8x16xf32>
    %cst_16 = arith.constant 31.5913029 : f32
    %40 = vector.broadcast %cst_16 : f32 to vector<8x16xf32>
    %41 = arith.mulf %40, %37 : vector<8x16xf32>
    %42 = arith.subf %39, %41 : vector<8x16xf32>
    %c1 = arith.constant 1 : index
    %c0_17 = arith.constant 0 : index
    %c0_18 = arith.constant 0 : index
    %43 = vector.load %arg5[%c1, %c0_17, %c0_18] : memref<17x8x16xf32, #tpu.memory_space<vmem>>, vector<1x8x16xf32>
    %44 = vector.shape_cast %43 : vector<1x8x16xf32> to vector<8x16xf32>
    %45 = arith.addf %42, %44 : vector<8x16xf32>
    %46 = arith.select %26, %0, %45 : vector<8x16xi1>, vector<8x16xf32>
    %c0_19 = arith.constant 0 : index
    %c14 = arith.constant 14 : index
    %47 = vector.load %arg2[%c0_19, %c14] : memref<32x16xf32, #tpu.memory_space<vmem>>, vector<32x1xf32>
    %cst_20 = arith.constant dense<0.000000e+00> : vector<32x16xf32>
    %48 = tpu.matmul %1, %46, %cst_20 {dimension_numbers = #tpu.dot_dimension_numbers<[1], [0], [0], [1], [0, 0, 1, 1], [], []>} : vector<32x8xf32>, vector<8x16xf32>, vector<32x16xf32> -> vector<32x16xf32>
    %49 = vector.broadcast %47 : vector<32x1xf32> to vector<32x16xf32>
    %50 = arith.addf %48, %49 : vector<32x16xf32>
    %51 = math.tanh %50 : vector<32x16xf32>
    %cst_21 = arith.constant dense<0.000000e+00> : vector<8x16xf32>
    %52 = tpu.matmul %2, %51, %cst_21 {dimension_numbers = #tpu.dot_dimension_numbers<[1], [0], [0], [1], [0, 0, 1, 1], [], []>} : vector<8x32xf32>, vector<32x16xf32>, vector<8x16xf32> -> vector<8x16xf32>
    %53 = vector.broadcast %3 : vector<8x1xf32> to vector<8x16xf32>
    %54 = arith.addf %52, %53 : vector<8x16xf32>
    %cst_22 = arith.constant 1.99052155 : f32
    %55 = vector.broadcast %cst_22 : f32 to vector<8x16xf32>
    %56 = arith.mulf %55, %46 : vector<8x16xf32>
    %cst_23 = arith.constant 1.49522805 : f32
    %57 = vector.broadcast %cst_23 : f32 to vector<8x16xf32>
    %58 = arith.mulf %57, %54 : vector<8x16xf32>
    %59 = arith.subf %56, %58 : vector<8x16xf32>
    %c2 = arith.constant 2 : index
    %c0_24 = arith.constant 0 : index
    %c0_25 = arith.constant 0 : index
    %60 = vector.load %arg5[%c2, %c0_24, %c0_25] : memref<17x8x16xf32, #tpu.memory_space<vmem>>, vector<1x8x16xf32>
    %61 = vector.shape_cast %60 : vector<1x8x16xf32> to vector<8x16xf32>
    %62 = arith.addf %59, %61 : vector<8x16xf32>
    %63 = arith.select %26, %0, %62 : vector<8x16xi1>, vector<8x16xf32>
    %c0_26 = arith.constant 0 : index
    %c13 = arith.constant 13 : index
    %64 = vector.load %arg2[%c0_26, %c13] : memref<32x16xf32, #tpu.memory_space<vmem>>, vector<32x1xf32>
    %cst_27 = arith.constant dense<0.000000e+00> : vector<32x16xf32>
    %65 = tpu.matmul %1, %63, %cst_27 {dimension_numbers = #tpu.dot_dimension_numbers<[1], [0], [0], [1], [0, 0, 1, 1], [], []>} : vector<32x8xf32>, vector<8x16xf32>, vector<32x16xf32> -> vector<32x16xf32>
    %66 = vector.broadcast %64 : vector<32x1xf32> to vector<32x16xf32>
    %67 = arith.addf %65, %66 : vector<32x16xf32>
    %68 = math.tanh %67 : vector<32x16xf32>
    %cst_28 = arith.constant dense<0.000000e+00> : vector<8x16xf32>
    %69 = tpu.matmul %2, %68, %cst_28 {dimension_numbers = #tpu.dot_dimension_numbers<[1], [0], [0], [1], [0, 0, 1, 1], [], []>} : vector<8x32xf32>, vector<32x16xf32>, vector<8x16xf32> -> vector<8x16xf32>
    %70 = vector.broadcast %3 : vector<8x1xf32> to vector<8x16xf32>
    %71 = arith.addf %69, %70 : vector<8x16xf32>
    %cst_29 = arith.constant 1.4881407 : f32
    %72 = vector.broadcast %cst_29 : f32 to vector<8x16xf32>
    %73 = arith.mulf %72, %63 : vector<8x16xf32>
    %cst_30 = arith.constant 0.831896424 : f32
    %74 = vector.broadcast %cst_30 : f32 to vector<8x16xf32>
    %75 = arith.mulf %74, %71 : vector<8x16xf32>
    %76 = arith.subf %73, %75 : vector<8x16xf32>
    %c3 = arith.constant 3 : index
    %c0_31 = arith.constant 0 : index
    %c0_32 = arith.constant 0 : index
    %77 = vector.load %arg5[%c3, %c0_31, %c0_32] : memref<17x8x16xf32, #tpu.memory_space<vmem>>, vector<1x8x16xf32>
    %78 = vector.shape_cast %77 : vector<1x8x16xf32> to vector<8x16xf32>
    %79 = arith.addf %76, %78 : vector<8x16xf32>
    %80 = arith.select %26, %0, %79 : vector<8x16xi1>, vector<8x16xf32>
    %c0_33 = arith.constant 0 : index
    %c12 = arith.constant 12 : index
    %81 = vector.load %arg2[%c0_33, %c12] : memref<32x16xf32, #tpu.memory_space<vmem>>, vector<32x1xf32>
    %cst_34 = arith.constant dense<0.000000e+00> : vector<32x16xf32>
    %82 = tpu.matmul %1, %80, %cst_34 {dimension_numbers = #tpu.dot_dimension_numbers<[1], [0], [0], [1], [0, 0, 1, 1], [], []>} : vector<32x8xf32>, vector<8x16xf32>, vector<32x16xf32> -> vector<32x16xf32>
    %83 = vector.broadcast %81 : vector<32x1xf32> to vector<32x16xf32>
    %84 = arith.addf %82, %83 : vector<32x16xf32>
    %85 = math.tanh %84 : vector<32x16xf32>
    %cst_35 = arith.constant dense<0.000000e+00> : vector<8x16xf32>
    %86 = tpu.matmul %2, %85, %cst_35 {dimension_numbers = #tpu.dot_dimension_numbers<[1], [0], [0], [1], [0, 0, 1, 1], [], []>} : vector<8x32xf32>, vector<32x16xf32>, vector<8x16xf32> -> vector<8x16xf32>
    %87 = vector.broadcast %3 : vector<8x1xf32> to vector<8x16xf32>
    %88 = arith.addf %86, %87 : vector<8x16xf32>
    %cst_36 = arith.constant 1.31854212 : f32
    %89 = vector.broadcast %cst_36 : f32 to vector<8x16xf32>
    %90 = arith.mulf %89, %80 : vector<8x16xf32>
    %cst_37 = arith.constant 0.584923923 : f32
    %91 = vector.broadcast %cst_37 : f32 to vector<8x16xf32>
    %92 = arith.mulf %91, %88 : vector<8x16xf32>
    %93 = arith.subf %90, %92 : vector<8x16xf32>
    %c4 = arith.constant 4 : index
    %c0_38 = arith.constant 0 : index
    %c0_39 = arith.constant 0 : index
    %94 = vector.load %arg5[%c4, %c0_38, %c0_39] : memref<17x8x16xf32, #tpu.memory_space<vmem>>, vector<1x8x16xf32>
    %95 = vector.shape_cast %94 : vector<1x8x16xf32> to vector<8x16xf32>
    %96 = arith.addf %93, %95 : vector<8x16xf32>
    %97 = arith.select %26, %0, %96 : vector<8x16xi1>, vector<8x16xf32>
    %c0_40 = arith.constant 0 : index
    %c11 = arith.constant 11 : index
    %98 = vector.load %arg2[%c0_40, %c11] : memref<32x16xf32, #tpu.memory_space<vmem>>, vector<32x1xf32>
    %cst_41 = arith.constant dense<0.000000e+00> : vector<32x16xf32>
    %99 = tpu.matmul %1, %97, %cst_41 {dimension_numbers = #tpu.dot_dimension_numbers<[1], [0], [0], [1], [0, 0, 1, 1], [], []>} : vector<32x8xf32>, vector<8x16xf32>, vector<32x16xf32> -> vector<32x16xf32>
    %100 = vector.broadcast %98 : vector<32x1xf32> to vector<32x16xf32>
    %101 = arith.addf %99, %100 : vector<32x16xf32>
    %102 = math.tanh %101 : vector<32x16xf32>
    %cst_42 = arith.constant dense<0.000000e+00> : vector<8x16xf32>
    %103 = tpu.matmul %2, %102, %cst_42 {dimension_numbers = #tpu.dot_dimension_numbers<[1], [0], [0], [1], [0, 0, 1, 1], [], []>} : vector<8x32xf32>, vector<32x16xf32>, vector<8x16xf32> -> vector<8x16xf32>
    %104 = vector.broadcast %3 : vector<8x1xf32> to vector<8x16xf32>
    %105 = arith.addf %103, %104 : vector<8x16xf32>
    %cst_43 = arith.constant 1.23210824 : f32
    %106 = vector.broadcast %cst_43 : f32 to vector<8x16xf32>
    %107 = arith.mulf %106, %97 : vector<8x16xf32>
    %cst_44 = arith.constant 0.454557717 : f32
    %108 = vector.broadcast %cst_44 : f32 to vector<8x16xf32>
    %109 = arith.mulf %108, %105 : vector<8x16xf32>
    %110 = arith.subf %107, %109 : vector<8x16xf32>
    %c5 = arith.constant 5 : index
    %c0_45 = arith.constant 0 : index
    %c0_46 = arith.constant 0 : index
    %111 = vector.load %arg5[%c5, %c0_45, %c0_46] : memref<17x8x16xf32, #tpu.memory_space<vmem>>, vector<1x8x16xf32>
    %112 = vector.shape_cast %111 : vector<1x8x16xf32> to vector<8x16xf32>
    %113 = arith.addf %110, %112 : vector<8x16xf32>
    %114 = arith.select %26, %0, %113 : vector<8x16xi1>, vector<8x16xf32>
    %c0_47 = arith.constant 0 : index
    %c10 = arith.constant 10 : index
    %115 = vector.load %arg2[%c0_47, %c10] : memref<32x16xf32, #tpu.memory_space<vmem>>, vector<32x1xf32>
    %cst_48 = arith.constant dense<0.000000e+00> : vector<32x16xf32>
    %116 = tpu.matmul %1, %114, %cst_48 {dimension_numbers = #tpu.dot_dimension_numbers<[1], [0], [0], [1], [0, 0, 1, 1], [], []>} : vector<32x8xf32>, vector<8x16xf32>, vector<32x16xf32> -> vector<32x16xf32>
    %117 = vector.broadcast %115 : vector<32x1xf32> to vector<32x16xf32>
    %118 = arith.addf %116, %117 : vector<32x16xf32>
    %119 = math.tanh %118 : vector<32x16xf32>
    %cst_49 = arith.constant dense<0.000000e+00> : vector<8x16xf32>
    %120 = tpu.matmul %2, %119, %cst_49 {dimension_numbers = #tpu.dot_dimension_numbers<[1], [0], [0], [1], [0, 0, 1, 1], [], []>} : vector<8x32xf32>, vector<32x16xf32>, vector<8x16xf32> -> vector<8x16xf32>
    %121 = vector.broadcast %3 : vector<8x1xf32> to vector<8x16xf32>
    %122 = arith.addf %120, %121 : vector<8x16xf32>
    %cst_50 = arith.constant 1.17890453 : f32
    %123 = vector.broadcast %cst_50 : f32 to vector<8x16xf32>
    %124 = arith.mulf %123, %114 : vector<8x16xf32>
    %cst_51 = arith.constant 0.374162704 : f32
    %125 = vector.broadcast %cst_51 : f32 to vector<8x16xf32>
    %126 = arith.mulf %125, %122 : vector<8x16xf32>
    %127 = arith.subf %124, %126 : vector<8x16xf32>
    %c6 = arith.constant 6 : index
    %c0_52 = arith.constant 0 : index
    %c0_53 = arith.constant 0 : index
    %128 = vector.load %arg5[%c6, %c0_52, %c0_53] : memref<17x8x16xf32, #tpu.memory_space<vmem>>, vector<1x8x16xf32>
    %129 = vector.shape_cast %128 : vector<1x8x16xf32> to vector<8x16xf32>
    %130 = arith.addf %127, %129 : vector<8x16xf32>
    %131 = arith.select %26, %0, %130 : vector<8x16xi1>, vector<8x16xf32>
    %c0_54 = arith.constant 0 : index
    %c9 = arith.constant 9 : index
    %132 = vector.load %arg2[%c0_54, %c9] : memref<32x16xf32, #tpu.memory_space<vmem>>, vector<32x1xf32>
    %cst_55 = arith.constant dense<0.000000e+00> : vector<32x16xf32>
    %133 = tpu.matmul %1, %131, %cst_55 {dimension_numbers = #tpu.dot_dimension_numbers<[1], [0], [0], [1], [0, 0, 1, 1], [], []>} : vector<32x8xf32>, vector<8x16xf32>, vector<32x16xf32> -> vector<32x16xf32>
    %134 = vector.broadcast %132 : vector<32x1xf32> to vector<32x16xf32>
    %135 = arith.addf %133, %134 : vector<32x16xf32>
    %136 = math.tanh %135 : vector<32x16xf32>
    %cst_56 = arith.constant dense<0.000000e+00> : vector<8x16xf32>
    %137 = tpu.matmul %2, %136, %cst_56 {dimension_numbers = #tpu.dot_dimension_numbers<[1], [0], [0], [1], [0, 0, 1, 1], [], []>} : vector<8x32xf32>, vector<32x16xf32>, vector<8x16xf32> -> vector<8x16xf32>
    %138 = vector.broadcast %3 : vector<8x1xf32> to vector<8x16xf32>
    %139 = arith.addf %137, %138 : vector<8x16xf32>
    %cst_57 = arith.constant 1.14227653 : f32
    %140 = vector.broadcast %cst_57 : f32 to vector<8x16xf32>
    %141 = arith.mulf %140, %131 : vector<8x16xf32>
    %cst_58 = arith.constant 0.319930822 : f32
    %142 = vector.broadcast %cst_58 : f32 to vector<8x16xf32>
    %143 = arith.mulf %142, %139 : vector<8x16xf32>
    %144 = arith.subf %141, %143 : vector<8x16xf32>
    %c7 = arith.constant 7 : index
    %c0_59 = arith.constant 0 : index
    %c0_60 = arith.constant 0 : index
    %145 = vector.load %arg5[%c7, %c0_59, %c0_60] : memref<17x8x16xf32, #tpu.memory_space<vmem>>, vector<1x8x16xf32>
    %146 = vector.shape_cast %145 : vector<1x8x16xf32> to vector<8x16xf32>
    %147 = arith.addf %144, %146 : vector<8x16xf32>
    %148 = arith.select %26, %0, %147 : vector<8x16xi1>, vector<8x16xf32>
    %c0_61 = arith.constant 0 : index
    %c8 = arith.constant 8 : index
    %149 = vector.load %arg2[%c0_61, %c8] : memref<32x16xf32, #tpu.memory_space<vmem>>, vector<32x1xf32>
    %cst_62 = arith.constant dense<0.000000e+00> : vector<32x16xf32>
    %150 = tpu.matmul %1, %148, %cst_62 {dimension_numbers = #tpu.dot_dimension_numbers<[1], [0], [0], [1], [0, 0, 1, 1], [], []>} : vector<32x8xf32>, vector<8x16xf32>, vector<32x16xf32> -> vector<32x16xf32>
    %151 = vector.broadcast %149 : vector<32x1xf32> to vector<32x16xf32>
    %152 = arith.addf %150, %151 : vector<32x16xf32>
    %153 = math.tanh %152 : vector<32x16xf32>
    %cst_63 = arith.constant dense<0.000000e+00> : vector<8x16xf32>
    %154 = tpu.matmul %2, %153, %cst_63 {dimension_numbers = #tpu.dot_dimension_numbers<[1], [0], [0], [1], [0, 0, 1, 1], [], []>} : vector<8x32xf32>, vector<32x16xf32>, vector<8x16xf32> -> vector<8x16xf32>
    %155 = vector.broadcast %3 : vector<8x1xf32> to vector<8x16xf32>
    %156 = arith.addf %154, %155 : vector<8x16xf32>
    %cst_64 = arith.constant 1.11507678 : f32
    %157 = vector.broadcast %cst_64 : f32 to vector<8x16xf32>
    %158 = arith.mulf %157, %148 : vector<8x16xf32>
    %cst_65 = arith.constant 0.281133682 : f32
    %159 = vector.broadcast %cst_65 : f32 to vector<8x16xf32>
    %160 = arith.mulf %159, %156 : vector<8x16xf32>
    %161 = arith.subf %158, %160 : vector<8x16xf32>
    %c8_66 = arith.constant 8 : index
    %c0_67 = arith.constant 0 : index
    %c0_68 = arith.constant 0 : index
    %162 = vector.load %arg5[%c8_66, %c0_67, %c0_68] : memref<17x8x16xf32, #tpu.memory_space<vmem>>, vector<1x8x16xf32>
    %163 = vector.shape_cast %162 : vector<1x8x16xf32> to vector<8x16xf32>
    %164 = arith.addf %161, %163 : vector<8x16xf32>
    %165 = arith.select %26, %0, %164 : vector<8x16xi1>, vector<8x16xf32>
    %c0_69 = arith.constant 0 : index
    %c7_70 = arith.constant 7 : index
    %166 = vector.load %arg2[%c0_69, %c7_70] : memref<32x16xf32, #tpu.memory_space<vmem>>, vector<32x1xf32>
    %cst_71 = arith.constant dense<0.000000e+00> : vector<32x16xf32>
    %167 = tpu.matmul %1, %165, %cst_71 {dimension_numbers = #tpu.dot_dimension_numbers<[1], [0], [0], [1], [0, 0, 1, 1], [], []>} : vector<32x8xf32>, vector<8x16xf32>, vector<32x16xf32> -> vector<32x16xf32>
    %168 = vector.broadcast %166 : vector<32x1xf32> to vector<32x16xf32>
    %169 = arith.addf %167, %168 : vector<32x16xf32>
    %170 = math.tanh %169 : vector<32x16xf32>
    %cst_72 = arith.constant dense<0.000000e+00> : vector<8x16xf32>
    %171 = tpu.matmul %2, %170, %cst_72 {dimension_numbers = #tpu.dot_dimension_numbers<[1], [0], [0], [1], [0, 0, 1, 1], [], []>} : vector<8x32xf32>, vector<32x16xf32>, vector<8x16xf32> -> vector<8x16xf32>
    %172 = vector.broadcast %3 : vector<8x1xf32> to vector<8x16xf32>
    %173 = arith.addf %171, %172 : vector<8x16xf32>
    %cst_73 = arith.constant 1.09372234 : f32
    %174 = vector.broadcast %cst_73 : f32 to vector<8x16xf32>
    %175 = arith.mulf %174, %165 : vector<8x16xf32>
    %cst_74 = arith.constant 0.252181351 : f32
    %176 = vector.broadcast %cst_74 : f32 to vector<8x16xf32>
    %177 = arith.mulf %176, %173 : vector<8x16xf32>
    %178 = arith.subf %175, %177 : vector<8x16xf32>
    %c9_75 = arith.constant 9 : index
    %c0_76 = arith.constant 0 : index
    %c0_77 = arith.constant 0 : index
    %179 = vector.load %arg5[%c9_75, %c0_76, %c0_77] : memref<17x8x16xf32, #tpu.memory_space<vmem>>, vector<1x8x16xf32>
    %180 = vector.shape_cast %179 : vector<1x8x16xf32> to vector<8x16xf32>
    %181 = arith.addf %178, %180 : vector<8x16xf32>
    %182 = arith.select %26, %0, %181 : vector<8x16xi1>, vector<8x16xf32>
    %c0_78 = arith.constant 0 : index
    %c6_79 = arith.constant 6 : index
    %183 = vector.load %arg2[%c0_78, %c6_79] : memref<32x16xf32, #tpu.memory_space<vmem>>, vector<32x1xf32>
    %cst_80 = arith.constant dense<0.000000e+00> : vector<32x16xf32>
    %184 = tpu.matmul %1, %182, %cst_80 {dimension_numbers = #tpu.dot_dimension_numbers<[1], [0], [0], [1], [0, 0, 1, 1], [], []>} : vector<32x8xf32>, vector<8x16xf32>, vector<32x16xf32> -> vector<32x16xf32>
    %185 = vector.broadcast %183 : vector<32x1xf32> to vector<32x16xf32>
    %186 = arith.addf %184, %185 : vector<32x16xf32>
    %187 = math.tanh %186 : vector<32x16xf32>
    %cst_81 = arith.constant dense<0.000000e+00> : vector<8x16xf32>
    %188 = tpu.matmul %2, %187, %cst_81 {dimension_numbers = #tpu.dot_dimension_numbers<[1], [0], [0], [1], [0, 0, 1, 1], [], []>} : vector<8x32xf32>, vector<32x16xf32>, vector<8x16xf32> -> vector<8x16xf32>
    %189 = vector.broadcast %3 : vector<8x1xf32> to vector<8x16xf32>
    %190 = arith.addf %188, %189 : vector<8x16xf32>
    %cst_82 = arith.constant 1.07621276 : f32
    %191 = vector.broadcast %cst_82 : f32 to vector<8x16xf32>
    %192 = arith.mulf %191, %182 : vector<8x16xf32>
    %cst_83 = arith.constant 0.22983025 : f32
    %193 = vector.broadcast %cst_83 : f32 to vector<8x16xf32>
    %194 = arith.mulf %193, %190 : vector<8x16xf32>
    %195 = arith.subf %192, %194 : vector<8x16xf32>
    %c10_84 = arith.constant 10 : index
    %c0_85 = arith.constant 0 : index
    %c0_86 = arith.constant 0 : index
    %196 = vector.load %arg5[%c10_84, %c0_85, %c0_86] : memref<17x8x16xf32, #tpu.memory_space<vmem>>, vector<1x8x16xf32>
    %197 = vector.shape_cast %196 : vector<1x8x16xf32> to vector<8x16xf32>
    %198 = arith.addf %195, %197 : vector<8x16xf32>
    %199 = arith.select %26, %0, %198 : vector<8x16xi1>, vector<8x16xf32>
    %c0_87 = arith.constant 0 : index
    %c5_88 = arith.constant 5 : index
    %200 = vector.load %arg2[%c0_87, %c5_88] : memref<32x16xf32, #tpu.memory_space<vmem>>, vector<32x1xf32>
    %cst_89 = arith.constant dense<0.000000e+00> : vector<32x16xf32>
    %201 = tpu.matmul %1, %199, %cst_89 {dimension_numbers = #tpu.dot_dimension_numbers<[1], [0], [0], [1], [0, 0, 1, 1], [], []>} : vector<32x8xf32>, vector<8x16xf32>, vector<32x16xf32> -> vector<32x16xf32>
    %202 = vector.broadcast %200 : vector<32x1xf32> to vector<32x16xf32>
    %203 = arith.addf %201, %202 : vector<32x16xf32>
    %204 = math.tanh %203 : vector<32x16xf32>
    %cst_90 = arith.constant dense<0.000000e+00> : vector<8x16xf32>
    %205 = tpu.matmul %2, %204, %cst_90 {dimension_numbers = #tpu.dot_dimension_numbers<[1], [0], [0], [1], [0, 0, 1, 1], [], []>} : vector<8x32xf32>, vector<32x16xf32>, vector<8x16xf32> -> vector<8x16xf32>
    %206 = vector.broadcast %3 : vector<8x1xf32> to vector<8x16xf32>
    %207 = arith.addf %205, %206 : vector<8x16xf32>
    %cst_91 = arith.constant 1.06133735 : f32
    %208 = vector.broadcast %cst_91 : f32 to vector<8x16xf32>
    %209 = arith.mulf %208, %199 : vector<8x16xf32>
    %cst_92 = arith.constant 0.211998448 : f32
    %210 = vector.broadcast %cst_92 : f32 to vector<8x16xf32>
    %211 = arith.mulf %210, %207 : vector<8x16xf32>
    %212 = arith.subf %209, %211 : vector<8x16xf32>
    %c11_93 = arith.constant 11 : index
    %c0_94 = arith.constant 0 : index
    %c0_95 = arith.constant 0 : index
    %213 = vector.load %arg5[%c11_93, %c0_94, %c0_95] : memref<17x8x16xf32, #tpu.memory_space<vmem>>, vector<1x8x16xf32>
    %214 = vector.shape_cast %213 : vector<1x8x16xf32> to vector<8x16xf32>
    %215 = arith.addf %212, %214 : vector<8x16xf32>
    %216 = arith.select %26, %0, %215 : vector<8x16xi1>, vector<8x16xf32>
    %c0_96 = arith.constant 0 : index
    %c4_97 = arith.constant 4 : index
    %217 = vector.load %arg2[%c0_96, %c4_97] : memref<32x16xf32, #tpu.memory_space<vmem>>, vector<32x1xf32>
    %cst_98 = arith.constant dense<0.000000e+00> : vector<32x16xf32>
    %218 = tpu.matmul %1, %216, %cst_98 {dimension_numbers = #tpu.dot_dimension_numbers<[1], [0], [0], [1], [0, 0, 1, 1], [], []>} : vector<32x8xf32>, vector<8x16xf32>, vector<32x16xf32> -> vector<32x16xf32>
    %219 = vector.broadcast %217 : vector<32x1xf32> to vector<32x16xf32>
    %220 = arith.addf %218, %219 : vector<32x16xf32>
    %221 = math.tanh %220 : vector<32x16xf32>
    %cst_99 = arith.constant dense<0.000000e+00> : vector<8x16xf32>
    %222 = tpu.matmul %2, %221, %cst_99 {dimension_numbers = #tpu.dot_dimension_numbers<[1], [0], [0], [1], [0, 0, 1, 1], [], []>} : vector<8x32xf32>, vector<32x16xf32>, vector<8x16xf32> -> vector<8x16xf32>
    %223 = vector.broadcast %3 : vector<8x1xf32> to vector<8x16xf32>
    %224 = arith.addf %222, %223 : vector<8x16xf32>
    %cst_100 = arith.constant 1.04831409 : f32
    %225 = vector.broadcast %cst_100 : f32 to vector<8x16xf32>
    %226 = arith.mulf %225, %216 : vector<8x16xf32>
    %cst_101 = arith.constant 0.197157308 : f32
    %227 = vector.broadcast %cst_101 : f32 to vector<8x16xf32>
    %228 = arith.mulf %227, %224 : vector<8x16xf32>
    %229 = arith.subf %226, %228 : vector<8x16xf32>
    %c12_102 = arith.constant 12 : index
    %c0_103 = arith.constant 0 : index
    %c0_104 = arith.constant 0 : index
    %230 = vector.load %arg5[%c12_102, %c0_103, %c0_104] : memref<17x8x16xf32, #tpu.memory_space<vmem>>, vector<1x8x16xf32>
    %231 = vector.shape_cast %230 : vector<1x8x16xf32> to vector<8x16xf32>
    %232 = arith.addf %229, %231 : vector<8x16xf32>
    %233 = arith.select %26, %0, %232 : vector<8x16xi1>, vector<8x16xf32>
    %c0_105 = arith.constant 0 : index
    %c3_106 = arith.constant 3 : index
    %234 = vector.load %arg2[%c0_105, %c3_106] : memref<32x16xf32, #tpu.memory_space<vmem>>, vector<32x1xf32>
    %cst_107 = arith.constant dense<0.000000e+00> : vector<32x16xf32>
    %235 = tpu.matmul %1, %233, %cst_107 {dimension_numbers = #tpu.dot_dimension_numbers<[1], [0], [0], [1], [0, 0, 1, 1], [], []>} : vector<32x8xf32>, vector<8x16xf32>, vector<32x16xf32> -> vector<32x16xf32>
    %236 = vector.broadcast %234 : vector<32x1xf32> to vector<32x16xf32>
    %237 = arith.addf %235, %236 : vector<32x16xf32>
    %238 = math.tanh %237 : vector<32x16xf32>
    %cst_108 = arith.constant dense<0.000000e+00> : vector<8x16xf32>
    %239 = tpu.matmul %2, %238, %cst_108 {dimension_numbers = #tpu.dot_dimension_numbers<[1], [0], [0], [1], [0, 0, 1, 1], [], []>} : vector<8x32xf32>, vector<32x16xf32>, vector<8x16xf32> -> vector<8x16xf32>
    %240 = vector.broadcast %3 : vector<8x1xf32> to vector<8x16xf32>
    %241 = arith.addf %239, %240 : vector<8x16xf32>
    %cst_109 = arith.constant 1.03660905 : f32
    %242 = vector.broadcast %cst_109 : f32 to vector<8x16xf32>
    %243 = arith.mulf %242, %233 : vector<8x16xf32>
    %cst_110 = arith.constant 0.183887467 : f32
    %244 = vector.broadcast %cst_110 : f32 to vector<8x16xf32>
    %245 = arith.mulf %244, %241 : vector<8x16xf32>
    %246 = arith.subf %243, %245 : vector<8x16xf32>
    %c13_111 = arith.constant 13 : index
    %c0_112 = arith.constant 0 : index
    %c0_113 = arith.constant 0 : index
    %247 = vector.load %arg5[%c13_111, %c0_112, %c0_113] : memref<17x8x16xf32, #tpu.memory_space<vmem>>, vector<1x8x16xf32>
    %248 = vector.shape_cast %247 : vector<1x8x16xf32> to vector<8x16xf32>
    %249 = arith.addf %246, %248 : vector<8x16xf32>
    %250 = arith.select %26, %0, %249 : vector<8x16xi1>, vector<8x16xf32>
    %c0_114 = arith.constant 0 : index
    %c2_115 = arith.constant 2 : index
    %251 = vector.load %arg2[%c0_114, %c2_115] : memref<32x16xf32, #tpu.memory_space<vmem>>, vector<32x1xf32>
    %cst_116 = arith.constant dense<0.000000e+00> : vector<32x16xf32>
    %252 = tpu.matmul %1, %250, %cst_116 {dimension_numbers = #tpu.dot_dimension_numbers<[1], [0], [0], [1], [0, 0, 1, 1], [], []>} : vector<32x8xf32>, vector<8x16xf32>, vector<32x16xf32> -> vector<32x16xf32>
    %253 = vector.broadcast %251 : vector<32x1xf32> to vector<32x16xf32>
    %254 = arith.addf %252, %253 : vector<32x16xf32>
    %255 = math.tanh %254 : vector<32x16xf32>
    %cst_117 = arith.constant dense<0.000000e+00> : vector<8x16xf32>
    %256 = tpu.matmul %2, %255, %cst_117 {dimension_numbers = #tpu.dot_dimension_numbers<[1], [0], [0], [1], [0, 0, 1, 1], [], []>} : vector<8x32xf32>, vector<32x16xf32>, vector<8x16xf32> -> vector<8x16xf32>
    %257 = vector.broadcast %3 : vector<8x1xf32> to vector<8x16xf32>
    %258 = arith.addf %256, %257 : vector<8x16xf32>
    %cst_118 = arith.constant 1.02583766 : f32
    %259 = vector.broadcast %cst_118 : f32 to vector<8x16xf32>
    %260 = arith.mulf %259, %250 : vector<8x16xf32>
    %cst_119 = arith.constant 0.170237198 : f32
    %261 = vector.broadcast %cst_119 : f32 to vector<8x16xf32>
    %262 = arith.mulf %261, %258 : vector<8x16xf32>
    %263 = arith.subf %260, %262 : vector<8x16xf32>
    %c14_120 = arith.constant 14 : index
    %c0_121 = arith.constant 0 : index
    %c0_122 = arith.constant 0 : index
    %264 = vector.load %arg5[%c14_120, %c0_121, %c0_122] : memref<17x8x16xf32, #tpu.memory_space<vmem>>, vector<1x8x16xf32>
    %265 = vector.shape_cast %264 : vector<1x8x16xf32> to vector<8x16xf32>
    %266 = arith.addf %263, %265 : vector<8x16xf32>
    %267 = arith.select %26, %0, %266 : vector<8x16xi1>, vector<8x16xf32>
    %c0_123 = arith.constant 0 : index
    %c1_124 = arith.constant 1 : index
    %268 = vector.load %arg2[%c0_123, %c1_124] : memref<32x16xf32, #tpu.memory_space<vmem>>, vector<32x1xf32>
    %cst_125 = arith.constant dense<0.000000e+00> : vector<32x16xf32>
    %269 = tpu.matmul %1, %267, %cst_125 {dimension_numbers = #tpu.dot_dimension_numbers<[1], [0], [0], [1], [0, 0, 1, 1], [], []>} : vector<32x8xf32>, vector<8x16xf32>, vector<32x16xf32> -> vector<32x16xf32>
    %270 = vector.broadcast %268 : vector<32x1xf32> to vector<32x16xf32>
    %271 = arith.addf %269, %270 : vector<32x16xf32>
    %272 = math.tanh %271 : vector<32x16xf32>
    %cst_126 = arith.constant dense<0.000000e+00> : vector<8x16xf32>
    %273 = tpu.matmul %2, %272, %cst_126 {dimension_numbers = #tpu.dot_dimension_numbers<[1], [0], [0], [1], [0, 0, 1, 1], [], []>} : vector<8x32xf32>, vector<32x16xf32>, vector<8x16xf32> -> vector<8x16xf32>
    %274 = vector.broadcast %3 : vector<8x1xf32> to vector<8x16xf32>
    %275 = arith.addf %273, %274 : vector<8x16xf32>
    %cst_127 = arith.constant 1.01570857 : f32
    %276 = vector.broadcast %cst_127 : f32 to vector<8x16xf32>
    %277 = arith.mulf %276, %267 : vector<8x16xf32>
    %cst_128 = arith.constant 0.151761457 : f32
    %278 = vector.broadcast %cst_128 : f32 to vector<8x16xf32>
    %279 = arith.mulf %278, %275 : vector<8x16xf32>
    %280 = arith.subf %277, %279 : vector<8x16xf32>
    %c15_129 = arith.constant 15 : index
    %c0_130 = arith.constant 0 : index
    %c0_131 = arith.constant 0 : index
    %281 = vector.load %arg5[%c15_129, %c0_130, %c0_131] : memref<17x8x16xf32, #tpu.memory_space<vmem>>, vector<1x8x16xf32>
    %282 = vector.shape_cast %281 : vector<1x8x16xf32> to vector<8x16xf32>
    %283 = arith.addf %280, %282 : vector<8x16xf32>
    %284 = arith.select %26, %0, %283 : vector<8x16xi1>, vector<8x16xf32>
    %c0_132 = arith.constant 0 : index
    %c0_133 = arith.constant 0 : index
    %285 = vector.load %arg2[%c0_132, %c0_133] : memref<32x16xf32, #tpu.memory_space<vmem>>, vector<32x1xf32>
    %cst_134 = arith.constant dense<0.000000e+00> : vector<32x16xf32>
    %286 = tpu.matmul %1, %284, %cst_134 {dimension_numbers = #tpu.dot_dimension_numbers<[1], [0], [0], [1], [0, 0, 1, 1], [], []>} : vector<32x8xf32>, vector<8x16xf32>, vector<32x16xf32> -> vector<32x16xf32>
    %287 = vector.broadcast %285 : vector<32x1xf32> to vector<32x16xf32>
    %288 = arith.addf %286, %287 : vector<32x16xf32>
    %289 = math.tanh %288 : vector<32x16xf32>
    %cst_135 = arith.constant dense<0.000000e+00> : vector<8x16xf32>
    %290 = tpu.matmul %2, %289, %cst_135 {dimension_numbers = #tpu.dot_dimension_numbers<[1], [0], [0], [1], [0, 0, 1, 1], [], []>} : vector<8x32xf32>, vector<32x16xf32>, vector<8x16xf32> -> vector<8x16xf32>
    %291 = vector.broadcast %3 : vector<8x1xf32> to vector<8x16xf32>
    %292 = arith.addf %290, %291 : vector<8x16xf32>
    %cst_136 = arith.constant 1.00598717 : f32
    %293 = vector.broadcast %cst_136 : f32 to vector<8x16xf32>
    %294 = arith.mulf %293, %284 : vector<8x16xf32>
    %cst_137 = arith.constant 0.109591059 : f32
    %295 = vector.broadcast %cst_137 : f32 to vector<8x16xf32>
    %296 = arith.mulf %295, %292 : vector<8x16xf32>
    %297 = arith.subf %294, %296 : vector<8x16xf32>
    %298 = arith.select %26, %0, %297 : vector<8x16xi1>, vector<8x16xf32>
    %c0_138 = arith.constant 0 : index
    %c0_139 = arith.constant 0 : index
    %299 = vector.load %arg6[%c0_138, %c0_139] : memref<8x16xf32, #tpu.memory_space<vmem>>, vector<8x16xf32>
    tpu.vector_store %arg6[%c0_138, %c0_139], %298 {strides = array<i32>} : memref<8x16xf32, #tpu.memory_space<vmem>>, vector<8x16xf32>,
    return
  }
}

</mosaic_0001>

<bundles_post_ra>
// kernel: _forward_impl.1
= control target key start
LH: loop header
LB: loop body
LE: loop exit
PB: predicated region body
PF: predicated region fallthrough
CT: control target
= control target key end

     0   :  { %v30_v0 = vlaneseq  ;;  %vm75_vm0 = vcmask 64512   ;;  %v3744_v2 = vmov 15   ;;  %v3745_v17 = vmov 0.0   ;;  %s4347_s1 = inlined_call_operand.vmem [shape: f32[32,8], index: 1, kind: input, shape index: {}]   ;;  %s4348_s2 = inlined_call_operand.vmem [shape: f32[32,16], index: 2, kind: input, shape index: {}]   ;;  %s4349_s0 = inlined_call_operand.vmem [shape: f32[8,16], index: 0, kind: input, shape index: {}]   ;;  %s4350_s5 = inlined_call_operand.vmem [shape: f32[17,8,16], index: 5, kind: input, shape index: {}]   ;;  %s4351_s4 = inlined_call_operand.vmem [shape: f32[8,1], index: 4, kind: input, shape index: {}]   ;;  %s4352_s3 = inlined_call_operand.vmem [shape: f32[8,32], index: 3, kind: input, shape index: {}]   ;;  %s4353_s6 = inlined_call_operand.vmem [shape: f32[8,16], index: 6, kind: output, shape index: {}]  }
   0x1   :  { %v3800_v1 = vld [vmem:[%s4347_s1] sm:$0xff]  ;;  %3574 = vset.pattern.permute.xlu1 %v3744_v2  ;;  %3573 = vset.pattern.permute.xlu0 %v3744_v2  ;;  %v3807_v5 = vld [vmem:[%s4348_s2 + $0x18] sm:$0xff]  ;;  %v3812_v6 = vld [vmem:[%s4348_s2 + $0x8] sm:$0xff]  ;;  %vm3746_vm4 = vmmov 0   ;;  %v3747_v18 = vmov 0   ;;  %vm182_vm5 = vcmask 261120  }
   0x2   :  { %v31_v3 = vshrl.u32 %v30_v0, 7  ;;  %v33_v4 = vand.u32 127, %v30_v0  ;;  %3253 = vmatprep.mubr.msk.f32.mxu0 %vm75_vm0, %v3800_v1  ;;  %v3817_v7 = vld [vmem:[%s4349_s0] sm:$0xff]  ;;  %72 = vperm.xlu0 %3573, %v3807_v5   ;;  %v3827_v10 = vld [vmem:[%s4348_s2 + $0x10] sm:$0xff]  ;;  %v3844_v14 = vld [vmem:[%s4347_s1 + $0x8] sm:$0xff]  ;;  %v3748_v37 = vmov 14  }
   0x3   :  { %62 = vperm.xlu1 %3574, %v3812_v6   ;;  %v49_v9 = vld [vmem:[%s4350_s5] sm:$0xff]  ;;  %v3851_v15 = vld [vmem:[%s4347_s1 + $0x10] sm:$0xff]  ;;  %v3860_v16 = vld [vmem:[%s4347_s1 + $0x18] sm:$0xff]  ;;  %3259 = vmatprep.subr.mxu1 %v3745_v17  ;;  %v3749_v0 = vmov 13   ;;  %vm2990_vm6 = vcmask 130048  }
   0x4   :  { %vm34_vm1 = vcmp.ge.s32.totalorder %v31_v3, 4  ;;  %v39_v8 = vand.u32 7, %v33_v4  ;;  %v3832_v11 = vld [vmem:[%s4348_s2] sm:$0xff]  ;;  %3267 = vmatprep.mubr.msk.f32.mxu1 %vm3746_vm4, %v3745_v17  ;;  %v3001_v44 = vld [vmem:[%s4350_s5 + $0x8] sm:$0xff] }
   0x5   :  { %v29_v19 = vld [vmem:[%s4351_s4] sm:$0xff] }
   0x6   :  { %vm47_vm2 = vcmp.lt.s32.totalorder %v39_v8, 2  ;;  %67 = vperm.xlu0 %3573, %v3827_v10   ;;  %v3878_v35 = vld [vmem:[%s4352_s3] sm:$0xff] }
   0x7   :  { %vm3834_vm3 = vmand %vm34_vm1, %vm47_vm2  ;;  %57 = vperm.xlu1 %3574, %v3832_v11  }
   0x8   :  { %v50_v13 = vsel %vm3834_vm3, %v3817_v7, %v49_v9 }
   0x9   :  { %3251 = vmatprep.subr.mxu0 %v50_v13  ;;  %v256_v40 = vmul.f32 31.622776, %v50_v13 }
   0xa   :  { %3252 = vmatpush3.msra.mxu0 %v50_v13  ;;  %3575 = vset.pattern.permute.xlu0 %v3747_v18  ;;  %v3007_v13 = vld [vmem:[%s4350_s5 + $0x10] sm:$0xff] }
   0xb   :  { %3254 = vmatmul.mubr.msk.f32.vlgmr.msra.gmra.mxu0 %vm75_vm0, %v3844_v14  ;;  %179 = vperm.xlu0 %3575, %v29_v19  }
   0xc   :  { %3256 = vmatprep.mubr.msk.f32.mxu0 %vm75_vm0, %v3851_v15  ;;  %3576 = vset.pattern.permute.xlu1 %v3748_v37 }
   0xd   :  { %276 = vperm.xlu1 %3576, %v3807_v5  }
   0xf   :  { %3257 = vmatmul.mubr.msk.f32.gmra.mxu0 %vm75_vm0, %v3860_v16  ;;  %3577 = vset.pattern.permute.xlu0 %v3748_v37 }
  0x10   :  { %3272 = vmatprep.mubr.msk.f32.mxu0 %vm75_vm0, %v3800_v1  ;;  %268 = vperm.xlu0 %3577, %v3812_v6  }
  0x11   :  { %272 = vperm.xlu1 %3576, %v3827_v10  }
  0x14   :  { %3579 = vset.pattern.permute.xlu0 %v3749_v0 }
  0x15   :  { %264 = vperm.xlu1 %3576, %v3832_v11   ;;  %454 = vperm.xlu0 %3579, %v3827_v10  }
  0x19   :  { %3578 = vset.pattern.permute.xlu1 %v3749_v0 }
  0x1a   :  { %458 = vperm.xlu1 %3578, %v3807_v5  }
  0x1e   :  { %450 = vperm.xlu1 %3578, %v3812_v6  }
  0x22   :  { %446 = vperm.xlu1 %3578, %v3832_v11  }
  0x7d   :  { %v73_v20 = vpop.permute.xlu0 %72 }
  0x7e   :  { %v63_v21 = vpop.permute.xlu1 %62 }
  0x81   :  { %v68_v25 = vpop.permute.xlu0 %67 }
  0x82   :  { %v58_v27 = vpop.permute.xlu1 %57 }
  0x86   :  { %v3890_v38 = vpop.permute.xlu0 %179 }
  0x88   :  { %v277_v48 = vpop.permute.xlu1 %276 }
  0x8b   :  { %v269_v52 = vpop.permute.xlu0 %268 }
  0x8c   :  { %v273_v49 = vpop.permute.xlu1 %272 }
  0x90   :  { %v265_v55 = vpop.permute.xlu1 %264 }
  0xcb   :  { %v3255_v22 = vpop.f32.mrf.mxu0 }
  0xcc   :  { %v160_v29 = vadd.f32 %v3255_v22, %v63_v21  ;;  %v459_v22 = vpop.permute.xlu1 %458 }
  0xcd   :  { %v154_v23 = vpop.f32.mrf.mxu0 }
  0xce   :  { %v155_v31 = vadd.f32 %v154_v23, %v58_v27  ;;  %v455_v27 = vpop.permute.xlu0 %454 }
  0xcf   :  { %v3258_v24 = vpop.f32.mrf.mxu0 }
  0xd0   :  { %v170_v26 = vadd.f32 %v3258_v24, %v73_v20  ;;  %v451_v23 = vpop.permute.xlu1 %450 }
  0xd1   :  { %v164_v28 = vpop.f32.mrf.mxu0 }
  0xd2   :  { %3606 = vtanh.f32 %v170_v26  ;;  %v165_v30 = vadd.f32 %v164_v28, %v68_v25 }
  0xd4   :  { %3608 = vtanh.f32 %v165_v30 }
  0xd5   :  { %3610 = vtanh.f32 %v160_v29  ;;  %v447_v29 = vpop.permute.xlu1 %446 }
  0xd6   :  { %3612 = vtanh.f32 %v155_v31 }
  0xdf   :  { %v3607_v32 = vpop.eup %3606 }
  0xe0   :  { %3260 = vmatpush3.msra.mxu1 %v3607_v32 }
  0xe1   :  { %v3609_v33 = vpop.eup %3608  ;;  %3261 = vmatprep.subr.mxu1 %v3745_v17 }
  0xe2   :  { %3262 = vmatpush3.msra.mxu1 %v3609_v33  ;;  %v3611_v34 = vpop.eup %3610 }
  0xe3   :  { %3263 = vmatprep.subr.mxu1 %v3745_v17  ;;  %v3613_v36 = vpop.eup %3612 }
  0xe4   :  { %3264 = vmatpush3.msra.mxu1 %v3611_v34 }
  0xe5   :  { %3265 = vmatprep.subr.mxu1 %v3745_v17 }
  0xe6   :  { %3266 = vmatpush3.msra.mxu1 %v3613_v36 }
  0xe7   :  { %3268 = vmatmul.mubr.msk.f32.vlgmr.msra.gmra.mxu1 %vm182_vm5, %v3878_v35  ;;  %3278 = vmatprep.subr.mxu1 %v3745_v17 }
  0xe8   :  { %3286 = vmatprep.mubr.msk.f32.mxu1 %vm3746_vm4, %v3745_v17 }
 0x1a7   :  { %v252_v39 = vpop.f32.mrf.mxu1 }
 0x1a8   :  { %v253_v41 = vadd.f32 %v252_v39, %v3890_v38 }
 0x1a9   :  { %v3269_v42 = vpop.f32.mrf.mxu1 }
 0x1aa   :  { %v257_v43 = vmul.f32 31.591303, %v253_v41 }
 0x1ac   :  { %v258_v45 = vsub.f32 %v256_v40, %v257_v43  ;;  %v3750_v40 = vmov 12  }
 0x1ad   :  { %3581 = vset.pattern.permute.xlu1 %v3750_v40  ;;  %3580 = vset.pattern.permute.xlu0 %v3750_v40 }
 0x1ae   :  { %v261_v46 = vadd.f32 %v3001_v44, %v258_v45  ;;  %636 = vperm.xlu1 %3581, %v3827_v10   ;;  %640 = vperm.xlu0 %3580, %v3807_v5  }
 0x1b0   :  { %v262_v47 = vsel %vm3834_vm3, %v3817_v7, %v261_v46  ;;  %v3013_v46 = vld [vmem:[%s4350_s5 + $0x18] sm:$0xff] }
 0x1b1   :  { %3270 = vmatprep.subr.mxu0 %v262_v47  ;;  %v438_v8 = vmul.f32 1.9905216, %v262_v47 }
 0x1b2   :  { %3271 = vmatpush3.msra.mxu0 %v262_v47  ;;  %632 = vperm.xlu1 %3581, %v3812_v6  }
 0x1b3   :  { %3273 = vmatmul.mubr.msk.f32.vlgmr.msra.gmra.mxu0 %vm75_vm0, %v3844_v14  ;;  %628 = vperm.xlu0 %3580, %v3832_v11  }
 0x1b4   :  { %3275 = vmatprep.mubr.msk.f32.mxu0 %vm75_vm0, %v3851_v15 }
 0x1b7   :  { %3276 = vmatmul.mubr.msk.f32.gmra.mxu0 %vm75_vm0, %v3860_v16 }
 0x1b8   :  { %3291 = vmatprep.mubr.msk.f32.mxu0 %vm75_vm0, %v3800_v1 }
 0x273   :  { %v3274_v50 = vpop.f32.mrf.mxu0 }
 0x274   :  { %v351_v57 = vadd.f32 %v3274_v50, %v269_v52  ;;  %v637_v50 = vpop.permute.xlu1 %636 }
 0x275   :  { %v345_v51 = vpop.f32.mrf.mxu0 }
 0x276   :  { %v346_v59 = vadd.f32 %v345_v51, %v265_v55  ;;  %v641_v51 = vpop.permute.xlu0 %640 }
 0x277   :  { %v3277_v53 = vpop.f32.mrf.mxu0 }
 0x278   :  { %v361_v54 = vadd.f32 %v3277_v53, %v277_v48 }
 0x279   :  { %v355_v56 = vpop.f32.mrf.mxu0 }
 0x27a   :  { %3614 = vtanh.f32 %v361_v54  ;;  %v356_v58 = vadd.f32 %v355_v56, %v273_v49  ;;  %v633_v54 = vpop.permute.xlu1 %632 }
 0x27c   :  { %3616 = vtanh.f32 %v356_v58 }
 0x27d   :  { %3618 = vtanh.f32 %v351_v57  ;;  %v629_v57 = vpop.permute.xlu0 %628 }
 0x27e   :  { %3620 = vtanh.f32 %v346_v59 }
 0x287   :  { %v3615_v60 = vpop.eup %3614 }
 0x288   :  { %3279 = vmatpush3.msra.mxu1 %v3615_v60 }
 0x289   :  { %v3617_v61 = vpop.eup %3616  ;;  %3280 = vmatprep.subr.mxu1 %v3745_v17 }
 0x28a   :  { %3281 = vmatpush3.msra.mxu1 %v3617_v61  ;;  %v3619_v62 = vpop.eup %3618 }
 0x28b   :  { %3282 = vmatprep.subr.mxu1 %v3745_v17  ;;  %v3621_v63 = vpop.eup %3620 }
 0x28c   :  { %3283 = vmatpush3.msra.mxu1 %v3619_v62 }
 0x28d   :  { %3284 = vmatprep.subr.mxu1 %v3745_v17 }
 0x28e   :  { %3285 = vmatpush3.msra.mxu1 %v3621_v63 }
 0x28f   :  { %3287 = vmatmul.mubr.msk.f32.vlgmr.msra.gmra.mxu1 %vm182_vm5, %v3878_v35  ;;  %3297 = vmatprep.subr.mxu1 %v3745_v17 }
 0x290   :  { %3305 = vmatprep.mubr.msk.f32.mxu1 %vm3746_vm4, %v3745_v17 }
 0x34f   :  { %v434_v2 = vpop.f32.mrf.mxu1 }
 0x350   :  { %v435_v3 = vadd.f32 %v434_v2, %v3890_v38 }
 0x351   :  { %v3288_v4 = vpop.f32.mrf.mxu1 }
 0x352   :  { %v439_v9 = vmul.f32 1.495228, %v435_v3  ;;  %v3751_v3 = vmov 11  }
 0x353   :  { %3582 = vset.pattern.permute.xlu1 %v3751_v3  ;;  %3583 = vset.pattern.permute.xlu0 %v3751_v3 }
 0x354   :  { %v440_v19 = vsub.f32 %v438_v8, %v439_v9  ;;  %822 = vperm.xlu1 %3582, %v3807_v5   ;;  %818 = vperm.xlu0 %3583, %v3827_v10  }
 0x356   :  { %v443_v20 = vadd.f32 %v3007_v13, %v440_v19 }
 0x358   :  { %v444_v21 = vsel %vm3834_vm3, %v3817_v7, %v443_v20  ;;  %814 = vperm.xlu1 %3582, %v3812_v6   ;;  %v3019_v20 = vld [vmem:[%s4350_s5 + $0x20] sm:$0xff] }
 0x359   :  { %3289 = vmatprep.subr.mxu0 %v444_v21  ;;  %v620_v44 = vmul.f32 1.4881407, %v444_v21 }
 0x35a   :  { %3290 = vmatpush3.msra.mxu0 %v444_v21 }
 0x35b   :  { %3292 = vmatmul.mubr.msk.f32.vlgmr.msra.gmra.mxu0 %vm75_vm0, %v3844_v14 }
 0x35c   :  { %3294 = vmatprep.mubr.msk.f32.mxu0 %vm75_vm0, %v3851_v15  ;;  %810 = vperm.xlu1 %3582, %v3832_v11  }
 0x35f   :  { %3295 = vmatmul.mubr.msk.f32.gmra.mxu0 %vm75_vm0, %v3860_v16 }
 0x360   :  { %3310 = vmatprep.mubr.msk.f32.mxu0 %vm75_vm0, %v3800_v1 }
 0x41b   :  { %v3293_v24 = vpop.f32.mrf.mxu0 }
 0x41c   :  { %v533_v31 = vadd.f32 %v3293_v24, %v451_v23  ;;  %v823_v24 = vpop.permute.xlu1 %822 }
 0x41d   :  { %v527_v25 = vpop.f32.mrf.mxu0 }
 0x41e   :  { %v528_v33 = vadd.f32 %v527_v25, %v447_v29  ;;  %v819_v29 = vpop.permute.xlu0 %818 }
 0x41f   :  { %v3296_v26 = vpop.f32.mrf.mxu0 }
 0x420   :  { %v543_v28 = vadd.f32 %v3296_v26, %v459_v22  ;;  %v815_v25 = vpop.permute.xlu1 %814 }
 0x421   :  { %v537_v30 = vpop.f32.mrf.mxu0 }
 0x422   :  { %3622 = vtanh.f32 %v543_v28  ;;  %v538_v32 = vadd.f32 %v537_v30, %v455_v27 }
 0x424   :  { %3624 = vtanh.f32 %v538_v32 }
 0x425   :  { %3626 = vtanh.f32 %v533_v31  ;;  %v811_v31 = vpop.permute.xlu1 %810 }
 0x426   :  { %3628 = vtanh.f32 %v528_v33 }
 0x42f   :  { %v3623_v34 = vpop.eup %3622 }
 0x430   :  { %3298 = vmatpush3.msra.mxu1 %v3623_v34 }
 0x431   :  { %v3625_v36 = vpop.eup %3624  ;;  %3299 = vmatprep.subr.mxu1 %v3745_v17 }
 0x432   :  { %3300 = vmatpush3.msra.mxu1 %v3625_v36  ;;  %v3627_v37 = vpop.eup %3626 }
 0x433   :  { %3301 = vmatprep.subr.mxu1 %v3745_v17  ;;  %v3629_v39 = vpop.eup %3628 }
 0x434   :  { %3302 = vmatpush3.msra.mxu1 %v3627_v37 }
 0x435   :  { %3303 = vmatprep.subr.mxu1 %v3745_v17 }
 0x436   :  { %3304 = vmatpush3.msra.mxu1 %v3629_v39 }
 0x437   :  { %3306 = vmatmul.mubr.msk.f32.vlgmr.msra.gmra.mxu1 %vm182_vm5, %v3878_v35  ;;  %3316 = vmatprep.subr.mxu1 %v3745_v17 }
 0x438   :  { %3324 = vmatprep.mubr.msk.f32.mxu1 %vm3746_vm4, %v3745_v17 }
 0x4f7   :  { %v616_v41 = vpop.f32.mrf.mxu1 }
 0x4f8   :  { %v617_v42 = vadd.f32 %v616_v41, %v3890_v38 }
 0x4f9   :  { %v3307_v43 = vpop.f32.mrf.mxu1 }
 0x4fa   :  { %v621_v45 = vmul.f32 0.8318964, %v617_v42  ;;  %v3752_v42 = vmov 10  }
 0x4fb   :  { %3585 = vset.pattern.permute.xlu1 %v3752_v42  ;;  %3584 = vset.pattern.permute.xlu0 %v3752_v42 }
 0x4fc   :  { %v622_v47 = vsub.f32 %v620_v44, %v621_v45  ;;  %1000 = vperm.xlu1 %3585, %v3827_v10   ;;  %1004 = vperm.xlu0 %3584, %v3807_v5  }
 0x4fe   :  { %v625_v48 = vadd.f32 %v3013_v46, %v622_v47 }
 0x500   :  { %v626_v49 = vsel %vm3834_vm3, %v3817_v7, %v625_v48  ;;  %996 = vperm.xlu1 %3585, %v3812_v6   ;;  %992 = vperm.xlu0 %3584, %v3832_v11   ;;  %v3025_v48 = vld [vmem:[%s4350_s5 + $0x28] sm:$0xff] }
 0x501   :  { %3308 = vmatprep.subr.mxu0 %v626_v49  ;;  %v802_v13 = vmul.f32 1.3185421, %v626_v49 }
 0x502   :  { %3309 = vmatpush3.msra.mxu0 %v626_v49 }
 0x503   :  { %3311 = vmatmul.mubr.msk.f32.vlgmr.msra.gmra.mxu0 %vm75_vm0, %v3844_v14 }
 0x504   :  { %3313 = vmatprep.mubr.msk.f32.mxu0 %vm75_vm0, %v3851_v15 }
 0x507   :  { %3314 = vmatmul.mubr.msk.f32.gmra.mxu0 %vm75_vm0, %v3860_v16 }
 0x508   :  { %3329 = vmatprep.mubr.msk.f32.mxu0 %vm75_vm0, %v3800_v1 }
 0x5c3   :  { %v3312_v52 = vpop.f32.mrf.mxu0 }
 0x5c4   :  { %v715_v59 = vadd.f32 %v3312_v52, %v633_v54  ;;  %v1001_v52 = vpop.permute.xlu1 %1000 }
 0x5c5   :  { %v709_v53 = vpop.f32.mrf.mxu0 }
 0x5c6   :  { %v710_v61 = vadd.f32 %v709_v53, %v629_v57  ;;  %v1005_v53 = vpop.permute.xlu0 %1004 }
 0x5c7   :  { %v3315_v55 = vpop.f32.mrf.mxu0 }
 0x5c8   :  { %v725_v56 = vadd.f32 %v3315_v55, %v641_v51 }
 0x5c9   :  { %v719_v58 = vpop.f32.mrf.mxu0 }
 0x5ca   :  { %3630 = vtanh.f32 %v725_v56  ;;  %v720_v60 = vadd.f32 %v719_v58, %v637_v50  ;;  %v997_v56 = vpop.permute.xlu1 %996 }
 0x5cc   :  { %3632 = vtanh.f32 %v720_v60 }
 0x5cd   :  { %3634 = vtanh.f32 %v715_v59  ;;  %v993_v59 = vpop.permute.xlu0 %992 }
 0x5ce   :  { %3636 = vtanh.f32 %v710_v61 }
 0x5d7   :  { %v3631_v62 = vpop.eup %3630 }
 0x5d8   :  { %3317 = vmatpush3.msra.mxu1 %v3631_v62 }
 0x5d9   :  { %v3633_v63 = vpop.eup %3632  ;;  %3318 = vmatprep.subr.mxu1 %v3745_v17 }
 0x5da   :  { %3319 = vmatpush3.msra.mxu1 %v3633_v63  ;;  %v3635_v0 = vpop.eup %3634 }
 0x5db   :  { %3320 = vmatprep.subr.mxu1 %v3745_v17  ;;  %v3637_v2 = vpop.eup %3636 }
 0x5dc   :  { %3321 = vmatpush3.msra.mxu1 %v3635_v0 }
 0x5dd   :  { %3322 = vmatprep.subr.mxu1 %v3745_v17 }
 0x5de   :  { %3323 = vmatpush3.msra.mxu1 %v3637_v2 }
 0x5df   :  { %3325 = vmatmul.mubr.msk.f32.vlgmr.msra.gmra.mxu1 %vm182_vm5, %v3878_v35  ;;  %3335 = vmatprep.subr.mxu1 %v3745_v17 }
 0x5e0   :  { %3343 = vmatprep.mubr.msk.f32.mxu1 %vm3746_vm4, %v3745_v17 }
 0x69f   :  { %v798_v4 = vpop.f32.mrf.mxu1 }
 0x6a0   :  { %v799_v8 = vadd.f32 %v798_v4, %v3890_v38 }
 0x6a1   :  { %v3326_v9 = vpop.f32.mrf.mxu1 }
 0x6a2   :  { %v803_v19 = vmul.f32 0.5849239, %v799_v8  ;;  %v3753_v8 = vmov 9  }
 0x6a3   :  { %3586 = vset.pattern.permute.xlu1 %v3753_v8  ;;  %3587 = vset.pattern.permute.xlu0 %v3753_v8 }
 0x6a4   :  { %v804_v21 = vsub.f32 %v802_v13, %v803_v19  ;;  %1186 = vperm.xlu1 %3586, %v3807_v5   ;;  %1182 = vperm.xlu0 %3587, %v3827_v10  }
 0x6a6   :  { %v807_v22 = vadd.f32 %v3019_v20, %v804_v21 }
 0x6a8   :  { %v808_v23 = vsel %vm3834_vm3, %v3817_v7, %v807_v22  ;;  %1178 = vperm.xlu1 %3586, %v3812_v6   ;;  %v3031_v22 = vld [vmem:[%s4350_s5 + $0x30] sm:$0xff] }
 0x6a9   :  { %3327 = vmatprep.subr.mxu0 %v808_v23  ;;  %v984_v46 = vmul.f32 1.2321082, %v808_v23 }
 0x6aa   :  { %3328 = vmatpush3.msra.mxu0 %v808_v23 }
 0x6ab   :  { %3330 = vmatmul.mubr.msk.f32.vlgmr.msra.gmra.mxu0 %vm75_vm0, %v3844_v14 }
 0x6ac   :  { %3332 = vmatprep.mubr.msk.f32.mxu0 %vm75_vm0, %v3851_v15  ;;  %1174 = vperm.xlu1 %3586, %v3832_v11  }
 0x6af   :  { %3333 = vmatmul.mubr.msk.f32.gmra.mxu0 %vm75_vm0, %v3860_v16 }
 0x6b0   :  { %3348 = vmatprep.mubr.msk.f32.mxu0 %vm75_vm0, %v3800_v1 }
 0x76b   :  { %v3331_v26 = vpop.f32.mrf.mxu0 }
 0x76c   :  { %v897_v33 = vadd.f32 %v3331_v26, %v815_v25  ;;  %v1187_v26 = vpop.permute.xlu1 %1186 }
 0x76d   :  { %v891_v27 = vpop.f32.mrf.mxu0 }
 0x76e   :  { %v892_v36 = vadd.f32 %v891_v27, %v811_v31  ;;  %v1183_v31 = vpop.permute.xlu0 %1182 }
 0x76f   :  { %v3334_v28 = vpop.f32.mrf.mxu0 }
 0x770   :  { %v907_v30 = vadd.f32 %v3334_v28, %v823_v24  ;;  %v1179_v27 = vpop.permute.xlu1 %1178 }
 0x771   :  { %v901_v32 = vpop.f32.mrf.mxu0 }
 0x772   :  { %3638 = vtanh.f32 %v907_v30  ;;  %v902_v34 = vadd.f32 %v901_v32, %v819_v29 }
 0x774   :  { %3640 = vtanh.f32 %v902_v34 }
 0x775   :  { %3642 = vtanh.f32 %v897_v33  ;;  %v1175_v33 = vpop.permute.xlu1 %1174 }
 0x776   :  { %3644 = vtanh.f32 %v892_v36 }
 0x77f   :  { %v3639_v37 = vpop.eup %3638 }
 0x780   :  { %3336 = vmatpush3.msra.mxu1 %v3639_v37 }
 0x781   :  { %v3641_v39 = vpop.eup %3640  ;;  %3337 = vmatprep.subr.mxu1 %v3745_v17 }
 0x782   :  { %3338 = vmatpush3.msra.mxu1 %v3641_v39  ;;  %v3643_v40 = vpop.eup %3642 }
 0x783   :  { %3339 = vmatprep.subr.mxu1 %v3745_v17  ;;  %v3645_v41 = vpop.eup %3644 }
 0x784   :  { %3340 = vmatpush3.msra.mxu1 %v3643_v40 }
 0x785   :  { %3341 = vmatprep.subr.mxu1 %v3745_v17 }
 0x786   :  { %3342 = vmatpush3.msra.mxu1 %v3645_v41 }
 0x787   :  { %3344 = vmatmul.mubr.msk.f32.vlgmr.msra.gmra.mxu1 %vm182_vm5, %v3878_v35  ;;  %3354 = vmatprep.subr.mxu1 %v3745_v17 }
 0x788   :  { %3362 = vmatprep.mubr.msk.f32.mxu1 %vm3746_vm4, %v3745_v17 }
 0x847   :  { %v980_v43 = vpop.f32.mrf.mxu1 }
 0x848   :  { %v981_v44 = vadd.f32 %v980_v43, %v3890_v38 }
 0x849   :  { %v3345_v45 = vpop.f32.mrf.mxu1 }
 0x84a   :  { %v985_v47 = vmul.f32 0.45455772, %v981_v44  ;;  %v3754_v44 = vmov 8  }
 0x84b   :  { %3589 = vset.pattern.permute.xlu1 %v3754_v44  ;;  %3588 = vset.pattern.permute.xlu0 %v3754_v44 }
 0x84c   :  { %v986_v49 = vsub.f32 %v984_v46, %v985_v47  ;;  %1364 = vperm.xlu1 %3589, %v3827_v10   ;;  %1368 = vperm.xlu0 %3588, %v3807_v5  }
 0x84e   :  { %v989_v50 = vadd.f32 %v3025_v48, %v986_v49 }
 0x850   :  { %v990_v51 = vsel %vm3834_vm3, %v3817_v7, %v989_v50  ;;  %1360 = vperm.xlu1 %3589, %v3812_v6   ;;  %1356 = vperm.xlu0 %3588, %v3832_v11   ;;  %v3037_v50 = vld [vmem:[%s4350_s5 + $0x38] sm:$0xff] }
 0x851   :  { %3346 = vmatprep.subr.mxu0 %v990_v51  ;;  %v1166_v20 = vmul.f32 1.1789045, %v990_v51 }
 0x852   :  { %3347 = vmatpush3.msra.mxu0 %v990_v51 }
 0x853   :  { %3349 = vmatmul.mubr.msk.f32.vlgmr.msra.gmra.mxu0 %vm75_vm0, %v3844_v14 }
 0x854   :  { %3351 = vmatprep.mubr.msk.f32.mxu0 %vm75_vm0, %v3851_v15 }
 0x857   :  { %3352 = vmatmul.mubr.msk.f32.gmra.mxu0 %vm75_vm0, %v3860_v16 }
 0x858   :  { %3367 = vmatprep.mubr.msk.f32.mxu0 %vm75_vm0, %v3800_v1 }
 0x913   :  { %v3350_v54 = vpop.f32.mrf.mxu0 }
 0x914   :  { %v1079_v61 = vadd.f32 %v3350_v54, %v997_v56  ;;  %v1365_v54 = vpop.permute.xlu1 %1364 }
 0x915   :  { %v1073_v55 = vpop.f32.mrf.mxu0 }
 0x916   :  { %v1074_v63 = vadd.f32 %v1073_v55, %v993_v59  ;;  %v1369_v55 = vpop.permute.xlu0 %1368 }
 0x917   :  { %v3353_v57 = vpop.f32.mrf.mxu0 }
 0x918   :  { %v1089_v58 = vadd.f32 %v3353_v57, %v1005_v53 }
 0x919   :  { %v1083_v60 = vpop.f32.mrf.mxu0 }
 0x91a   :  { %3646 = vtanh.f32 %v1089_v58  ;;  %v1084_v62 = vadd.f32 %v1083_v60, %v1001_v52  ;;  %v1361_v58 = vpop.permute.xlu1 %1360 }
 0x91c   :  { %3648 = vtanh.f32 %v1084_v62 }
 0x91d   :  { %3650 = vtanh.f32 %v1079_v61  ;;  %v1357_v61 = vpop.permute.xlu0 %1356 }
 0x91e   :  { %3652 = vtanh.f32 %v1074_v63 }
 0x927   :  { %v3647_v0 = vpop.eup %3646 }
 0x928   :  { %3355 = vmatpush3.msra.mxu1 %v3647_v0 }
 0x929   :  { %v3649_v2 = vpop.eup %3648  ;;  %3356 = vmatprep.subr.mxu1 %v3745_v17 }
 0x92a   :  { %3357 = vmatpush3.msra.mxu1 %v3649_v2  ;;  %v3651_v3 = vpop.eup %3650 }
 0x92b   :  { %3358 = vmatprep.subr.mxu1 %v3745_v17  ;;  %v3653_v4 = vpop.eup %3652 }
 0x92c   :  { %3359 = vmatpush3.msra.mxu1 %v3651_v3 }
 0x92d   :  { %3360 = vmatprep.subr.mxu1 %v3745_v17 }
 0x92e   :  { %3361 = vmatpush3.msra.mxu1 %v3653_v4 }
 0x92f   :  { %3363 = vmatmul.mubr.msk.f32.vlgmr.msra.gmra.mxu1 %vm182_vm5, %v3878_v35  ;;  %3373 = vmatprep.subr.mxu1 %v3745_v17 }
 0x930   :  { %3381 = vmatprep.mubr.msk.f32.mxu1 %vm3746_vm4, %v3745_v17 }
 0x9ef   :  { %v1162_v9 = vpop.f32.mrf.mxu1 }
 0x9f0   :  { %v1163_v13 = vadd.f32 %v1162_v9, %v3890_v38 }
 0x9f1   :  { %v3364_v19 = vpop.f32.mrf.mxu1 }
 0x9f2   :  { %v1167_v21 = vmul.f32 0.3741627, %v1163_v13  ;;  %v3755_v13 = vmov 7  }
 0x9f3   :  { %3590 = vset.pattern.permute.xlu1 %v3755_v13  ;;  %3591 = vset.pattern.permute.xlu0 %v3755_v13 }
 0x9f4   :  { %v1168_v23 = vsub.f32 %v1166_v20, %v1167_v21  ;;  %1550 = vperm.xlu1 %3590, %v3807_v5   ;;  %1546 = vperm.xlu0 %3591, %v3827_v10  }
 0x9f6   :  { %v1171_v24 = vadd.f32 %v3031_v22, %v1168_v23 }
 0x9f8   :  { %v1172_v25 = vsel %vm3834_vm3, %v3817_v7, %v1171_v24  ;;  %1542 = vperm.xlu1 %3590, %v3812_v6   ;;  %v3043_v24 = vld [vmem:[%s4350_s5 + $0x40] sm:$0xff] }
 0x9f9   :  { %3365 = vmatprep.subr.mxu0 %v1172_v25  ;;  %v1348_v48 = vmul.f32 1.1422765, %v1172_v25 }
 0x9fa   :  { %3366 = vmatpush3.msra.mxu0 %v1172_v25 }
 0x9fb   :  { %3368 = vmatmul.mubr.msk.f32.vlgmr.msra.gmra.mxu0 %vm75_vm0, %v3844_v14 }
 0x9fc   :  { %3370 = vmatprep.mubr.msk.f32.mxu0 %vm75_vm0, %v3851_v15  ;;  %1538 = vperm.xlu1 %3590, %v3832_v11  }
 0x9ff   :  { %3371 = vmatmul.mubr.msk.f32.gmra.mxu0 %vm75_vm0, %v3860_v16 }
 0xa00   :  { %3386 = vmatprep.mubr.msk.f32.mxu0 %vm75_vm0, %v3800_v1 }
 0xabb   :  { %v3369_v28 = vpop.f32.mrf.mxu0 }
 0xabc   :  { %v1261_v36 = vadd.f32 %v3369_v28, %v1179_v27  ;;  %v1551_v28 = vpop.permute.xlu1 %1550 }
 0xabd   :  { %v1255_v29 = vpop.f32.mrf.mxu0 }
 0xabe   :  { %v1256_v39 = vadd.f32 %v1255_v29, %v1175_v33  ;;  %v1547_v33 = vpop.permute.xlu0 %1546 }
 0xabf   :  { %v3372_v30 = vpop.f32.mrf.mxu0 }
 0xac0   :  { %v1271_v32 = vadd.f32 %v3372_v30, %v1187_v26  ;;  %v1543_v29 = vpop.permute.xlu1 %1542 }
 0xac1   :  { %v1265_v34 = vpop.f32.mrf.mxu0 }
 0xac2   :  { %3654 = vtanh.f32 %v1271_v32  ;;  %v1266_v37 = vadd.f32 %v1265_v34, %v1183_v31 }
 0xac4   :  { %3656 = vtanh.f32 %v1266_v37 }
 0xac5   :  { %3658 = vtanh.f32 %v1261_v36  ;;  %v1539_v36 = vpop.permute.xlu1 %1538 }
 0xac6   :  { %3660 = vtanh.f32 %v1256_v39 }
 0xacf   :  { %v3655_v40 = vpop.eup %3654 }
 0xad0   :  { %3374 = vmatpush3.msra.mxu1 %v3655_v40 }
 0xad1   :  { %v3657_v41 = vpop.eup %3656  ;;  %3375 = vmatprep.subr.mxu1 %v3745_v17 }
 0xad2   :  { %3376 = vmatpush3.msra.mxu1 %v3657_v41  ;;  %v3659_v42 = vpop.eup %3658 }
 0xad3   :  { %3377 = vmatprep.subr.mxu1 %v3745_v17  ;;  %v3661_v43 = vpop.eup %3660 }
 0xad4   :  { %3378 = vmatpush3.msra.mxu1 %v3659_v42 }
 0xad5   :  { %3379 = vmatprep.subr.mxu1 %v3745_v17 }
 0xad6   :  { %3380 = vmatpush3.msra.mxu1 %v3661_v43 }
 0xad7   :  { %3382 = vmatmul.mubr.msk.f32.vlgmr.msra.gmra.mxu1 %vm182_vm5, %v3878_v35  ;;  %3392 = vmatprep.subr.mxu1 %v3745_v17 }
 0xad8   :  { %3400 = vmatprep.mubr.msk.f32.mxu1 %vm3746_vm4, %v3745_v17 }
 0xb97   :  { %v1344_v45 = vpop.f32.mrf.mxu1 }
 0xb98   :  { %v1345_v46 = vadd.f32 %v1344_v45, %v3890_v38 }
 0xb99   :  { %v3383_v47 = vpop.f32.mrf.mxu1 }
 0xb9a   :  { %v1349_v49 = vmul.f32 0.31993082, %v1345_v46  ;;  %v3756_v46 = vmov 6  }
 0xb9b   :  { %3593 = vset.pattern.permute.xlu1 %v3756_v46  ;;  %3592 = vset.pattern.permute.xlu0 %v3756_v46 }
 0xb9c   :  { %v1350_v51 = vsub.f32 %v1348_v48, %v1349_v49  ;;  %1728 = vperm.xlu1 %3593, %v3827_v10   ;;  %1732 = vperm.xlu0 %3592, %v3807_v5  }
 0xb9e   :  { %v1353_v52 = vadd.f32 %v3037_v50, %v1350_v51 }
 0xba0   :  { %v1354_v53 = vsel %vm3834_vm3, %v3817_v7, %v1353_v52  ;;  %1724 = vperm.xlu1 %3593, %v3812_v6   ;;  %1720 = vperm.xlu0 %3592, %v3832_v11   ;;  %v3049_v52 = vld [vmem:[%s4350_s5 + $0x48] sm:$0xff] }
 0xba1   :  { %3384 = vmatprep.subr.mxu0 %v1354_v53  ;;  %v1530_v22 = vmul.f32 1.1150768, %v1354_v53 }
 0xba2   :  { %3385 = vmatpush3.msra.mxu0 %v1354_v53 }
 0xba3   :  { %3387 = vmatmul.mubr.msk.f32.vlgmr.msra.gmra.mxu0 %vm75_vm0, %v3844_v14 }
 0xba4   :  { %3389 = vmatprep.mubr.msk.f32.mxu0 %vm75_vm0, %v3851_v15 }
 0xba7   :  { %3390 = vmatmul.mubr.msk.f32.gmra.mxu0 %vm75_vm0, %v3860_v16 }
 0xba8   :  { %3405 = vmatprep.mubr.msk.f32.mxu0 %vm75_vm0, %v3800_v1 }
 0xc17   :  { %v1729_v6 = vpop.permute.xlu1 %1728  ;;  %v1733_v10 = vpop.permute.xlu0 %1732 }
 0xc63   :  { %v3388_v56 = vpop.f32.mrf.mxu0 }
 0xc64   :  { %v1443_v63 = vadd.f32 %v3388_v56, %v1361_v58  ;;  %v1725_v56 = vpop.permute.xlu1 %1724  ;;  %v1721_v58 = vpop.permute.xlu0 %1720 }
 0xc65   :  { %v1437_v57 = vpop.f32.mrf.mxu0 }
 0xc66   :  { %v1438_v2 = vadd.f32 %v1437_v57, %v1357_v61 }
 0xc67   :  { %v3391_v59 = vpop.f32.mrf.mxu0 }
 0xc68   :  { %v1453_v60 = vadd.f32 %v3391_v59, %v1369_v55 }
 0xc69   :  { %v1447_v62 = vpop.f32.mrf.mxu0 }
 0xc6a   :  { %3662 = vtanh.f32 %v1453_v60  ;;  %v1448_v0 = vadd.f32 %v1447_v62, %v1365_v54 }
 0xc6c   :  { %3664 = vtanh.f32 %v1448_v0  ;;  %v4134_v0 = vld [vmem:[%s4348_s2 + $0x18] sm:$0xff] }
 0xc6d   :  { %3666 = vtanh.f32 %v1443_v63  ;;  %v3757_v63 = vmov 5  }
 0xc6e   :  { %3668 = vtanh.f32 %v1438_v2  ;;  %3594 = vset.pattern.permute.xlu1 %v3757_v63  ;;  %3595 = vset.pattern.permute.xlu0 %v3757_v63  ;;  %v4140_v2 = vld [vmem:[%s4348_s2 + $0x10] sm:$0xff] }
 0xc6f   :  { %1914 = vperm.xlu1 %3594, %v4134_v0   ;;  %1910 = vperm.xlu0 %3595, %v4140_v2  }
 0xc77   :  { %v3663_v3 = vpop.eup %3662 }
 0xc78   :  { %3393 = vmatpush3.msra.mxu1 %v3663_v3  ;;  %v4152_v3 = vld [vmem:[%s4348_s2] sm:$0xff] }
 0xc79   :  { %v3665_v4 = vpop.eup %3664  ;;  %3394 = vmatprep.subr.mxu1 %v3745_v17 }
 0xc7a   :  { %3395 = vmatpush3.msra.mxu1 %v3665_v4  ;;  %v3667_v8 = vpop.eup %3666 }
 0xc7b   :  { %3396 = vmatprep.subr.mxu1 %v3745_v17  ;;  %v3669_v9 = vpop.eup %3668 }
 0xc7c   :  { %3397 = vmatpush3.msra.mxu1 %v3667_v8 }
 0xc7d   :  { %3398 = vmatprep.subr.mxu1 %v3745_v17 }
 0xc7e   :  { %3399 = vmatpush3.msra.mxu1 %v3669_v9 }
 0xc7f   :  { %3401 = vmatmul.mubr.msk.f32.vlgmr.msra.gmra.mxu1 %vm182_vm5, %v3878_v35  ;;  %3411 = vmatprep.subr.mxu1 %v3745_v17 }
 0xc80   :  { %3419 = vmatprep.mubr.msk.f32.mxu1 %vm3746_vm4, %v3745_v17 }
 0xd3f   :  { %v1526_v19 = vpop.f32.mrf.mxu1 }
 0xd40   :  { %v1527_v20 = vadd.f32 %v1526_v19, %v3890_v38 }
 0xd41   :  { %v3402_v21 = vpop.f32.mrf.mxu1 }
 0xd42   :  { %v1531_v23 = vmul.f32 0.28113368, %v1527_v20  ;;  %v3055_v20 = vld [vmem:[%s4350_s5 + $0x50] sm:$0xff] }
 0xd44   :  { %v1532_v25 = vsub.f32 %v1530_v22, %v1531_v23  ;;  %v4162_v23 = vld [vmem:[%s4349_s0] sm:$0xff] }
 0xd46   :  { %v1535_v26 = vadd.f32 %v3043_v24, %v1532_v25  ;;  %v4170_v25 = vld [vmem:[%s4347_s1 + $0x8] sm:$0xff] }
 0xd48   :  { %v1536_v27 = vsel %vm3834_vm3, %v3817_v7, %v1535_v26  ;;  %v4177_v26 = vld [vmem:[%s4347_s1 + $0x10] sm:$0xff] }
 0xd49   :  { %3403 = vmatprep.subr.mxu0 %v1536_v27  ;;  %v1712_v50 = vmul.f32 1.0937223, %v1536_v27 }
 0xd4a   :  { %3404 = vmatpush3.msra.mxu0 %v1536_v27  ;;  %v4184_v27 = vld [vmem:[%s4347_s1 + $0x18] sm:$0xff] }
 0xd4b   :  { %3406 = vmatmul.mubr.msk.f32.vlgmr.msra.gmra.mxu0 %vm75_vm0, %v3844_v14 }
 0xd4c   :  { %3408 = vmatprep.mubr.msk.f32.mxu0 %vm75_vm0, %v3851_v15 }
 0xd4f   :  { %3409 = vmatmul.mubr.msk.f32.gmra.mxu0 %vm75_vm0, %v3860_v16 }
 0xd50   :  { %3424 = vmatprep.mubr.msk.f32.mxu0 %vm75_vm0, %v3800_v1 }
 0xe0b   :  { %v3407_v30 = vpop.f32.mrf.mxu0 }
 0xe0c   :  { %v1625_v39 = vadd.f32 %v3407_v30, %v1543_v29  ;;  %v1915_v29 = vpop.permute.xlu1 %1914 }
 0xe0d   :  { %v1619_v31 = vpop.f32.mrf.mxu0 }
 0xe0e   :  { %v1620_v41 = vadd.f32 %v1619_v31, %v1539_v36 }
 0xe0f   :  { %v3410_v32 = vpop.f32.mrf.mxu0 }
 0xe10   :  { %v1635_v34 = vadd.f32 %v3410_v32, %v1551_v28  ;;  %v4191_v28 = vld [vmem:[%s4347_s1] sm:$0xff] }
 0xe11   :  { %v1629_v37 = vpop.f32.mrf.mxu0 }
 0xe12   :  { %3670 = vtanh.f32 %v1635_v34  ;;  %v1630_v40 = vadd.f32 %v1629_v37, %v1547_v33  ;;  %v1911_v34 = vpop.permute.xlu0 %1910 }
 0xe14   :  { %3672 = vtanh.f32 %v1630_v40 }
 0xe15   :  { %3674 = vtanh.f32 %v1625_v39 }
 0xe16   :  { %3676 = vtanh.f32 %v1620_v41 }
 0xe1f   :  { %v3671_v42 = vpop.eup %3670 }
 0xe20   :  { %3412 = vmatpush3.msra.mxu1 %v3671_v42 }
 0xe21   :  { %v3673_v43 = vpop.eup %3672  ;;  %3413 = vmatprep.subr.mxu1 %v3745_v17 }
 0xe22   :  { %3414 = vmatpush3.msra.mxu1 %v3673_v43  ;;  %v3675_v44 = vpop.eup %3674 }
 0xe23   :  { %3415 = vmatprep.subr.mxu1 %v3745_v17  ;;  %v3677_v45 = vpop.eup %3676 }
 0xe24   :  { %3416 = vmatpush3.msra.mxu1 %v3675_v44 }
 0xe25   :  { %3417 = vmatprep.subr.mxu1 %v3745_v17 }
 0xe26   :  { %3418 = vmatpush3.msra.mxu1 %v3677_v45 }
 0xe27   :  { %3420 = vmatmul.mubr.msk.f32.vlgmr.msra.gmra.mxu1 %vm182_vm5, %v3878_v35  ;;  %3430 = vmatprep.subr.mxu1 %v3745_v17 }
 0xe28   :  { %3438 = vmatprep.mubr.msk.f32.mxu1 %vm3746_vm4, %v3745_v17 }
 0xee7   :  { %v1708_v47 = vpop.f32.mrf.mxu1 }
 0xee8   :  { %v1709_v48 = vadd.f32 %v1708_v47, %v3890_v38  ;;  %v4201_v47 = vld [vmem:[%s4352_s3] sm:$0xff] }
 0xee9   :  { %v3421_v49 = vpop.f32.mrf.mxu1 }
 0xeea   :  { %v1713_v51 = vmul.f32 0.25218135, %v1709_v48  ;;  %v3758_v48 = vmov 4  }
 0xeeb   :  { %3596 = vset.pattern.permute.xlu0 %v3758_v48 }
 0xeec   :  { %v1714_v53 = vsub.f32 %v1712_v50, %v1713_v51  ;;  %2096 = vperm.xlu0 %3596, %v4134_v0  }
 0xeee   :  { %v1717_v54 = vadd.f32 %v3049_v52, %v1714_v53 }
 0xef0   :  { %v1718_v5 = vsel %vm3834_vm3, %v3817_v7, %v1717_v54  ;;  %2084 = vperm.xlu0 %3596, %v4152_v3   ;;  %v3061_v54 = vld [vmem:[%s4350_s5 + $0x58] sm:$0xff] }
 0xef1   :  { %3422 = vmatprep.subr.mxu0 %v1718_v5  ;;  %v1894_v13 = vmul.f32 1.0762128, %v1718_v5 }
 0xef2   :  { %3423 = vmatpush3.msra.mxu0 %v1718_v5 }
 0xef3   :  { %3425 = vmatmul.mubr.msk.f32.vlgmr.msra.gmra.mxu0 %vm75_vm0, %v3844_v14 }
 0xef4   :  { %3427 = vmatprep.mubr.msk.f32.mxu0 %vm75_vm0, %v3851_v15 }
 0xef7   :  { %3428 = vmatmul.mubr.msk.f32.gmra.mxu0 %vm75_vm0, %v3860_v16 }
 0xef8   :  { %3443 = vmatprep.mubr.msk.f32.mxu0 %vm75_vm0, %v3800_v1 }
 0xfb3   :  { %v3426_v11 = vpop.f32.mrf.mxu0 }
 0xfb4   :  { %v1807_v60 = vadd.f32 %v3426_v11, %v1725_v56 }
 0xfb5   :  { %v1801_v55 = vpop.f32.mrf.mxu0 }
 0xfb6   :  { %v1802_v61 = vadd.f32 %v1801_v55, %v1721_v58  ;;  %v2097_v55 = vpop.permute.xlu0 %2096 }
 0xfb7   :  { %v3429_v7 = vpop.f32.mrf.mxu0 }
 0xfb8   :  { %v1817_v57 = vadd.f32 %v3429_v7, %v1733_v10 }
 0xfb9   :  { %v1811_v59 = vpop.f32.mrf.mxu0 }
 0xfba   :  { %3678 = vtanh.f32 %v1817_v57  ;;  %v1812_v14 = vadd.f32 %v1811_v59, %v1729_v6 }
 0xfbc   :  { %3680 = vtanh.f32 %v1812_v14 }
 0xfbd   :  { %3682 = vtanh.f32 %v1807_v60  ;;  %v2085_v60 = vpop.permute.xlu0 %2084 }
 0xfbe   :  { %3684 = vtanh.f32 %v1802_v61 }
 0xfc7   :  { %v3679_v15 = vpop.eup %3678 }
 0xfc8   :  { %3431 = vmatpush3.msra.mxu1 %v3679_v15 }
 0xfc9   :  { %v3681_v16 = vpop.eup %3680  ;;  %3432 = vmatprep.subr.mxu1 %v3745_v17 }
 0xfca   :  { %3433 = vmatpush3.msra.mxu1 %v3681_v16  ;;  %v3683_v1 = vpop.eup %3682 }
 0xfcb   :  { %3434 = vmatprep.subr.mxu1 %v3745_v17  ;;  %v3685_v62 = vpop.eup %3684 }
 0xfcc   :  { %3435 = vmatpush3.msra.mxu1 %v3683_v1 }
 0xfcd   :  { %3436 = vmatprep.subr.mxu1 %v3745_v17 }
 0xfce   :  { %3437 = vmatpush3.msra.mxu1 %v3685_v62 }
 0xfcf   :  { %3439 = vmatmul.mubr.msk.f32.vlgmr.msra.gmra.mxu1 %vm182_vm5, %v3878_v35  ;;  %3449 = vmatprep.subr.mxu1 %v3745_v17  ;;  %v4146_v35 = vld [vmem:[%s4348_s2 + $0x8] sm:$0xff] }
 0xfd0   :  { %3457 = vmatprep.mubr.msk.f32.mxu1 %vm3746_vm4, %v3745_v17  ;;  %1906 = vperm.xlu1 %3594, %v4146_v35  }
 0xfd4   :  { %1902 = vperm.xlu1 %3594, %v4152_v3  }
 0xfd8   :  { %3597 = vset.pattern.permute.xlu1 %v3758_v48 }
 0xfd9   :  { %2092 = vperm.xlu1 %3597, %v4140_v2  }
 0xfdd   :  { %2088 = vperm.xlu1 %3597, %v4146_v35  }
0x104b   :  { %v1907_v30 = vpop.permute.xlu1 %1906 }
0x104f   :  { %v1903_v37 = vpop.permute.xlu1 %1902 }
0x1054   :  { %v2093_v11 = vpop.permute.xlu1 %2092 }
0x1058   :  { %v2089_v57 = vpop.permute.xlu1 %2088 }
0x108f   :  { %v1890_v4 = vpop.f32.mrf.mxu1 }
0x1090   :  { %v1891_v8 = vadd.f32 %v1890_v4, %v3890_v38 }
0x1091   :  { %v3440_v9 = vpop.f32.mrf.mxu1 }
0x1092   :  { %v1895_v19 = vmul.f32 0.22983025, %v1891_v8  ;;  %v3759_v8 = vmov 3  }
0x1093   :  { %3598 = vset.pattern.permute.xlu1 %v3759_v8  ;;  %3599 = vset.pattern.permute.xlu0 %v3759_v8 }
0x1094   :  { %v1896_v21 = vsub.f32 %v1894_v13, %v1895_v19  ;;  %2278 = vperm.xlu1 %3598, %v4134_v0   ;;  %2274 = vperm.xlu0 %3599, %v4140_v2  }
0x1096   :  { %v1899_v22 = vadd.f32 %v3055_v20, %v1896_v21 }
0x1098   :  { %v1900_v24 = vsel %vm3834_vm3, %v4162_v23, %v1899_v22  ;;  %2270 = vperm.xlu1 %3598, %v4146_v35   ;;  %v3067_v22 = vld [vmem:[%s4350_s5 + $0x60] sm:$0xff] }
0x1099   :  { %3441 = vmatprep.subr.mxu0 %v1900_v24  ;;  %v2076_v52 = vmul.f32 1.0613374, %v1900_v24 }
0x109a   :  { %3442 = vmatpush3.msra.mxu0 %v1900_v24 }
0x109b   :  { %3444 = vmatmul.mubr.msk.f32.vlgmr.msra.gmra.mxu0 %vm75_vm0, %v4170_v25 }
0x109c   :  { %3446 = vmatprep.mubr.msk.f32.mxu0 %vm75_vm0, %v4177_v26  ;;  %2266 = vperm.xlu1 %3598, %v4152_v3  }
0x109f   :  { %3447 = vmatmul.mubr.msk.f32.gmra.mxu0 %vm75_vm0, %v4184_v27 }
0x10a0   :  { %3462 = vmatprep.mubr.msk.f32.mxu0 %vm75_vm0, %v4191_v28 }
0x115b   :  { %v3445_v31 = vpop.f32.mrf.mxu0 }
0x115c   :  { %v1989_v40 = vadd.f32 %v3445_v31, %v1907_v30  ;;  %v2279_v31 = vpop.permute.xlu1 %2278 }
0x115d   :  { %v1983_v32 = vpop.f32.mrf.mxu0 }
0x115e   :  { %v1984_v42 = vadd.f32 %v1983_v32, %v1903_v37  ;;  %v2275_v37 = vpop.permute.xlu0 %2274 }
0x115f   :  { %v3448_v33 = vpop.f32.mrf.mxu0 }
0x1160   :  { %v1999_v36 = vadd.f32 %v3448_v33, %v1915_v29  ;;  %v2271_v32 = vpop.permute.xlu1 %2270 }
0x1161   :  { %v1993_v39 = vpop.f32.mrf.mxu0 }
0x1162   :  { %3686 = vtanh.f32 %v1999_v36  ;;  %v1994_v41 = vadd.f32 %v1993_v39, %v1911_v34 }
0x1164   :  { %3688 = vtanh.f32 %v1994_v41 }
0x1165   :  { %3690 = vtanh.f32 %v1989_v40  ;;  %v2267_v40 = vpop.permute.xlu1 %2266 }
0x1166   :  { %3692 = vtanh.f32 %v1984_v42 }
0x116f   :  { %v3687_v43 = vpop.eup %3686 }
0x1170   :  { %3450 = vmatpush3.msra.mxu1 %v3687_v43 }
0x1171   :  { %v3689_v44 = vpop.eup %3688  ;;  %3451 = vmatprep.subr.mxu1 %v3745_v17 }
0x1172   :  { %3452 = vmatpush3.msra.mxu1 %v3689_v44  ;;  %v3691_v45 = vpop.eup %3690 }
0x1173   :  { %3453 = vmatprep.subr.mxu1 %v3745_v17  ;;  %v3693_v46 = vpop.eup %3692 }
0x1174   :  { %3454 = vmatpush3.msra.mxu1 %v3691_v45 }
0x1175   :  { %3455 = vmatprep.subr.mxu1 %v3745_v17 }
0x1176   :  { %3456 = vmatpush3.msra.mxu1 %v3693_v46 }
0x1177   :  { %3458 = vmatmul.mubr.msk.f32.vlgmr.msra.gmra.mxu1 %vm182_vm5, %v4201_v47  ;;  %3468 = vmatprep.subr.mxu1 %v3745_v17 }
0x1178   :  { %3476 = vmatprep.mubr.msk.f32.mxu1 %vm3746_vm4, %v3745_v17 }
0x1237   :  { %v2072_v49 = vpop.f32.mrf.mxu1 }
0x1238   :  { %v2073_v50 = vadd.f32 %v2072_v49, %v3890_v38 }
0x1239   :  { %v3459_v51 = vpop.f32.mrf.mxu1 }
0x123a   :  { %v2077_v53 = vmul.f32 0.21199845, %v2073_v50  ;;  %v3760_v50 = vmov 2  }
0x123b   :  { %3601 = vset.pattern.permute.xlu1 %v3760_v50  ;;  %3600 = vset.pattern.permute.xlu0 %v3760_v50 }
0x123c   :  { %v2078_v5 = vsub.f32 %v2076_v52, %v2077_v53  ;;  %2456 = vperm.xlu1 %3601, %v4140_v2   ;;  %2460 = vperm.xlu0 %3600, %v4134_v0  }
0x123e   :  { %v2081_v6 = vadd.f32 %v3061_v54, %v2078_v5 }
0x1240   :  { %v2082_v10 = vsel %vm3834_vm3, %v4162_v23, %v2081_v6  ;;  %2452 = vperm.xlu1 %3601, %v4146_v35   ;;  %2448 = vperm.xlu0 %3600, %v4152_v3   ;;  %v3073_v6 = vld [vmem:[%s4350_s5 + $0x68] sm:$0xff] }
0x1241   :  { %3460 = vmatprep.subr.mxu0 %v2082_v10  ;;  %v2258_v20 = vmul.f32 1.0483141, %v2082_v10 }
0x1242   :  { %3461 = vmatpush3.msra.mxu0 %v2082_v10 }
0x1243   :  { %3463 = vmatmul.mubr.msk.f32.vlgmr.msra.gmra.mxu0 %vm75_vm0, %v4170_v25 }
0x1244   :  { %3465 = vmatprep.mubr.msk.f32.mxu0 %vm75_vm0, %v4177_v26 }
0x1247   :  { %3466 = vmatmul.mubr.msk.f32.gmra.mxu0 %vm75_vm0, %v4184_v27 }
0x1248   :  { %3481 = vmatprep.mubr.msk.f32.mxu0 %vm75_vm0, %v4191_v28 }
0x1303   :  { %v3464_v56 = vpop.f32.mrf.mxu0 }
0x1304   :  { %v2171_v61 = vadd.f32 %v3464_v56, %v2089_v57  ;;  %v2457_v56 = vpop.permute.xlu1 %2456 }
0x1305   :  { %v2165_v7 = vpop.f32.mrf.mxu0 }
0x1306   :  { %v2166_v16 = vadd.f32 %v2165_v7, %v2085_v60  ;;  %v2461_v7 = vpop.permute.xlu0 %2460 }
0x1307   :  { %v3467_v58 = vpop.f32.mrf.mxu0 }
0x1308   :  { %v2181_v59 = vadd.f32 %v3467_v58, %v2097_v55 }
0x1309   :  { %v2175_v14 = vpop.f32.mrf.mxu0 }
0x130a   :  { %3694 = vtanh.f32 %v2181_v59  ;;  %v2176_v15 = vadd.f32 %v2175_v14, %v2093_v11  ;;  %v2453_v59 = vpop.permute.xlu1 %2452 }
0x130c   :  { %3696 = vtanh.f32 %v2176_v15 }
0x130d   :  { %3698 = vtanh.f32 %v2171_v61  ;;  %v2449_v61 = vpop.permute.xlu0 %2448 }
0x130e   :  { %3700 = vtanh.f32 %v2166_v16 }
0x1317   :  { %v3695_v1 = vpop.eup %3694 }
0x1318   :  { %3469 = vmatpush3.msra.mxu1 %v3695_v1 }
0x1319   :  { %v3697_v62 = vpop.eup %3696  ;;  %3470 = vmatprep.subr.mxu1 %v3745_v17 }
0x131a   :  { %3471 = vmatpush3.msra.mxu1 %v3697_v62  ;;  %v3699_v63 = vpop.eup %3698 }
0x131b   :  { %3472 = vmatprep.subr.mxu1 %v3745_v17  ;;  %v3701_v4 = vpop.eup %3700 }
0x131c   :  { %3473 = vmatpush3.msra.mxu1 %v3699_v63 }
0x131d   :  { %3474 = vmatprep.subr.mxu1 %v3745_v17 }
0x131e   :  { %3475 = vmatpush3.msra.mxu1 %v3701_v4 }
0x131f   :  { %3477 = vmatmul.mubr.msk.f32.vlgmr.msra.gmra.mxu1 %vm182_vm5, %v4201_v47  ;;  %3487 = vmatprep.subr.mxu1 %v3745_v17 }
0x1320   :  { %3495 = vmatprep.mubr.msk.f32.mxu1 %vm3746_vm4, %v3745_v17 }
0x13df   :  { %v2254_v9 = vpop.f32.mrf.mxu1 }
0x13e0   :  { %v2255_v13 = vadd.f32 %v2254_v9, %v3890_v38 }
0x13e1   :  { %v3478_v19 = vpop.f32.mrf.mxu1 }
0x13e2   :  { %v2259_v21 = vmul.f32 0.19715731, %v2255_v13  ;;  %v3761_v13 = vmov 1  }
0x13e3   :  { %3602 = vset.pattern.permute.xlu1 %v3761_v13  ;;  %3603 = vset.pattern.permute.xlu0 %v3761_v13 }
0x13e4   :  { %v2260_v24 = vsub.f32 %v2258_v20, %v2259_v21  ;;  %2642 = vperm.xlu1 %3602, %v4134_v0   ;;  %2638 = vperm.xlu0 %3603, %v4140_v2  }
0x13e6   :  { %v2263_v29 = vadd.f32 %v3067_v22, %v2260_v24 }
0x13e8   :  { %v2264_v30 = vsel %vm3834_vm3, %v4162_v23, %v2263_v29  ;;  %2634 = vperm.xlu1 %3602, %v4146_v35   ;;  %3604 = vset.pattern.permute.xlu0 %v3747_v18 }
0x13e9   :  { %3479 = vmatprep.subr.mxu0 %v2264_v30  ;;  %v2440_v54 = vmul.f32 1.036609, %v2264_v30  ;;  %2824 = vperm.xlu0 %3604, %v4134_v0   ;;  %v3079_v0 = vld [vmem:[%s4350_s5 + $0x70] sm:$0xff] }
0x13ea   :  { %3480 = vmatpush3.msra.mxu0 %v2264_v30 }
0x13eb   :  { %3482 = vmatmul.mubr.msk.f32.vlgmr.msra.gmra.mxu0 %vm75_vm0, %v4170_v25 }
0x13ec   :  { %3484 = vmatprep.mubr.msk.f32.mxu0 %vm75_vm0, %v4177_v26  ;;  %2630 = vperm.xlu1 %3602, %v4152_v3  }
0x13ed   :  { %2812 = vperm.xlu0 %3604, %v4152_v3  }
0x13ef   :  { %3485 = vmatmul.mubr.msk.f32.gmra.mxu0 %vm75_vm0, %v4184_v27 }
0x13f0   :  { %3500 = vmatprep.mubr.msk.f32.mxu0 %vm75_vm0, %v4191_v28  ;;  %3605 = vset.pattern.permute.xlu1 %v3747_v18 }
0x13f1   :  { %2820 = vperm.xlu1 %3605, %v4140_v2  }
0x13f5   :  { %2816 = vperm.xlu1 %3605, %v4146_v35  }
0x145f   :  { %v2643_v2 = vpop.permute.xlu1 %2642 }
0x1463   :  { %v2635_v35 = vpop.permute.xlu1 %2634 }
0x14ab   :  { %v3483_v33 = vpop.f32.mrf.mxu0 }
0x14ac   :  { %v2353_v42 = vadd.f32 %v3483_v33, %v2271_v32  ;;  %v2639_v33 = vpop.permute.xlu0 %2638 }
0x14ad   :  { %v2347_v34 = vpop.f32.mrf.mxu0 }
0x14ae   :  { %v2348_v44 = vadd.f32 %v2347_v34, %v2267_v40 }
0x14af   :  { %v3486_v36 = vpop.f32.mrf.mxu0 }
0x14b0   :  { %v2363_v39 = vadd.f32 %v3486_v36, %v2279_v31  ;;  %v2631_v36 = vpop.permute.xlu1 %2630 }
0x14b1   :  { %v2357_v41 = vpop.f32.mrf.mxu0 }
0x14b2   :  { %3702 = vtanh.f32 %v2363_v39  ;;  %v2358_v43 = vadd.f32 %v2357_v41, %v2275_v37 }
0x14b4   :  { %3704 = vtanh.f32 %v2358_v43 }
0x14b5   :  { %3706 = vtanh.f32 %v2353_v42 }
0x14b6   :  { %3708 = vtanh.f32 %v2348_v44 }
0x14bf   :  { %v3703_v45 = vpop.eup %3702 }
0x14c0   :  { %3488 = vmatpush3.msra.mxu1 %v3703_v45 }
0x14c1   :  { %v3705_v46 = vpop.eup %3704  ;;  %3489 = vmatprep.subr.mxu1 %v3745_v17 }
0x14c2   :  { %3490 = vmatpush3.msra.mxu1 %v3705_v46  ;;  %v3707_v48 = vpop.eup %3706 }
0x14c3   :  { %3491 = vmatprep.subr.mxu1 %v3745_v17  ;;  %v3709_v49 = vpop.eup %3708 }
0x14c4   :  { %3492 = vmatpush3.msra.mxu1 %v3707_v48 }
0x14c5   :  { %3493 = vmatprep.subr.mxu1 %v3745_v17 }
0x14c6   :  { %3494 = vmatpush3.msra.mxu1 %v3709_v49 }
0x14c7   :  { %3496 = vmatmul.mubr.msk.f32.vlgmr.msra.gmra.mxu1 %vm182_vm5, %v4201_v47  ;;  %3506 = vmatprep.subr.mxu1 %v3745_v17 }
0x14c8   :  { %3514 = vmatprep.mubr.msk.f32.mxu1 %vm3746_vm4, %v3745_v17 }
0x1587   :  { %v2436_v51 = vpop.f32.mrf.mxu1 }
0x1588   :  { %v2437_v52 = vadd.f32 %v2436_v51, %v3890_v38  ;;  %v3085_v51 = vld [vmem:[%s4350_s5 + $0x78] sm:$0xff] }
0x1589   :  { %v3497_v53 = vpop.f32.mrf.mxu1 }
0x158a   :  { %v2441_v5 = vmul.f32 0.18388747, %v2437_v52 }
0x158c   :  { %v2442_v10 = vsub.f32 %v2440_v54, %v2441_v5  ;;  %v2821_v5 = vpop.permute.xlu1 %2820 }
0x158e   :  { %v2445_v11 = vadd.f32 %v3073_v6, %v2442_v10  ;;  %v2825_v10 = vpop.permute.xlu0 %2824 }
0x1590   :  { %v2446_v55 = vsel %vm3834_vm3, %v4162_v23, %v2445_v11 }
0x1591   :  { %3498 = vmatprep.subr.mxu0 %v2446_v55  ;;  %v2622_v22 = vmul.f32 1.0258377, %v2446_v55 }
0x1592   :  { %3499 = vmatpush3.msra.mxu0 %v2446_v55 }
0x1593   :  { %3501 = vmatmul.mubr.msk.f32.vlgmr.msra.gmra.mxu0 %vm75_vm0, %v4170_v25 }
0x1594   :  { %3503 = vmatprep.mubr.msk.f32.mxu0 %vm75_vm0, %v4177_v26 }
0x1597   :  { %3504 = vmatmul.mubr.msk.f32.gmra.mxu0 %vm75_vm0, %v4184_v27 }
0x1598   :  { %3519 = vmatprep.mubr.msk.f32.mxu0 %vm75_vm0, %v4191_v28 }
0x1653   :  { %v3502_v57 = vpop.f32.mrf.mxu0 }
0x1654   :  { %v2535_v16 = vadd.f32 %v3502_v57, %v2453_v59 }
0x1655   :  { %v2529_v58 = vpop.f32.mrf.mxu0 }
0x1656   :  { %v2530_v62 = vadd.f32 %v2529_v58, %v2449_v61  ;;  %v2813_v58 = vpop.permute.xlu0 %2812 }
0x1657   :  { %v3505_v60 = vpop.f32.mrf.mxu0 }
0x1658   :  { %v2545_v14 = vadd.f32 %v3505_v60, %v2461_v7 }
0x1659   :  { %v2539_v15 = vpop.f32.mrf.mxu0 }
0x165a   :  { %3710 = vtanh.f32 %v2545_v14  ;;  %v2540_v1 = vadd.f32 %v2539_v15, %v2457_v56  ;;  %v2817_v56 = vpop.permute.xlu1 %2816 }
0x165c   :  { %3712 = vtanh.f32 %v2540_v1 }
0x165d   :  { %3714 = vtanh.f32 %v2535_v16 }
0x165e   :  { %3716 = vtanh.f32 %v2530_v62 }
0x1667   :  { %v3711_v63 = vpop.eup %3710 }
0x1668   :  { %3507 = vmatpush3.msra.mxu1 %v3711_v63 }
0x1669   :  { %v3713_v4 = vpop.eup %3712  ;;  %3508 = vmatprep.subr.mxu1 %v3745_v17 }
0x166a   :  { %3509 = vmatpush3.msra.mxu1 %v3713_v4  ;;  %v3715_v8 = vpop.eup %3714 }
0x166b   :  { %3510 = vmatprep.subr.mxu1 %v3745_v17  ;;  %v3717_v9 = vpop.eup %3716 }
0x166c   :  { %3511 = vmatpush3.msra.mxu1 %v3715_v8 }
0x166d   :  { %3512 = vmatprep.subr.mxu1 %v3745_v17 }
0x166e   :  { %3513 = vmatpush3.msra.mxu1 %v3717_v9 }
0x166f   :  { %3515 = vmatmul.mubr.msk.f32.vlgmr.msra.gmra.mxu1 %vm182_vm5, %v4201_v47  ;;  %3525 = vmatprep.subr.mxu1 %v3745_v17 }
0x1670   :  { %3533 = vmatprep.mubr.msk.f32.mxu1 %vm3746_vm4, %v3745_v17 }
0x172f   :  { %v2618_v19 = vpop.f32.mrf.mxu1 }
0x1730   :  { %v2619_v20 = vadd.f32 %v2618_v19, %v3890_v38 }
0x1731   :  { %v3516_v21 = vpop.f32.mrf.mxu1 }
0x1732   :  { %v2623_v24 = vmul.f32 0.1702372, %v2619_v20 }
0x1734   :  { %v2624_v29 = vsub.f32 %v2622_v22, %v2623_v24 }
0x1736   :  { %v2627_v30 = vadd.f32 %v3079_v0, %v2624_v29 }
0x1738   :  { %v2628_v18 = vsel %vm3834_vm3, %v4162_v23, %v2627_v30 }
0x1739   :  { %3517 = vmatprep.subr.mxu0 %v2628_v18  ;;  %v2804_v49 = vmul.f32 1.0157086, %v2628_v18 }
0x173a   :  { %3518 = vmatpush3.msra.mxu0 %v2628_v18 }
0x173b   :  { %3520 = vmatmul.mubr.msk.f32.vlgmr.msra.gmra.mxu0 %vm75_vm0, %v4170_v25 }
0x173c   :  { %3522 = vmatprep.mubr.msk.f32.mxu0 %vm75_vm0, %v4177_v26 }
0x173f   :  { %3523 = vmatmul.mubr.msk.f32.gmra.mxu0 %vm75_vm0, %v4184_v27 }
0x1740   :  { %3538 = vmatprep.mubr.msk.f32.mxu0 %vm75_vm0, %v4191_v28 }
0x17fb   :  { %v3521_v3 = vpop.f32.mrf.mxu0 }
0x17fc   :  { %v2717_v39 = vadd.f32 %v3521_v3, %v2635_v35 }
0x17fd   :  { %v2711_v31 = vpop.f32.mrf.mxu0 }
0x17fe   :  { %v2712_v41 = vadd.f32 %v2711_v31, %v2631_v36 }
0x17ff   :  { %v3524_v32 = vpop.f32.mrf.mxu0 }
0x1800   :  { %v2727_v34 = vadd.f32 %v3524_v32, %v2643_v2 }
0x1801   :  { %v2721_v37 = vpop.f32.mrf.mxu0 }
0x1802   :  { %3718 = vtanh.f32 %v2727_v34  ;;  %v2722_v40 = vadd.f32 %v2721_v37, %v2639_v33 }
0x1804   :  { %3720 = vtanh.f32 %v2722_v40 }
0x1805   :  { %3722 = vtanh.f32 %v2717_v39 }
0x1806   :  { %3724 = vtanh.f32 %v2712_v41 }
0x180f   :  { %v3719_v42 = vpop.eup %3718 }
0x1810   :  { %3526 = vmatpush3.msra.mxu1 %v3719_v42 }
0x1811   :  { %v3721_v43 = vpop.eup %3720  ;;  %3527 = vmatprep.subr.mxu1 %v3745_v17 }
0x1812   :  { %3528 = vmatpush3.msra.mxu1 %v3721_v43  ;;  %v3723_v28 = vpop.eup %3722 }
0x1813   :  { %3529 = vmatprep.subr.mxu1 %v3745_v17  ;;  %v3725_v44 = vpop.eup %3724 }
0x1814   :  { %3530 = vmatpush3.msra.mxu1 %v3723_v28 }
0x1815   :  { %3531 = vmatprep.subr.mxu1 %v3745_v17 }
0x1816   :  { %3532 = vmatpush3.msra.mxu1 %v3725_v44 }
0x1817   :  { %3534 = vmatmul.mubr.msk.f32.vlgmr.msra.gmra.mxu1 %vm182_vm5, %v4201_v47  ;;  %3544 = vmatprep.subr.mxu1 %v3745_v17 }
0x1818   :  { %3552 = vmatprep.mubr.msk.f32.mxu1 %vm3746_vm4, %v3745_v17 }
0x18d7   :  { %v2800_v45 = vpop.f32.mrf.mxu1 }
0x18d8   :  { %v2801_v46 = vadd.f32 %v2800_v45, %v3890_v38 }
0x18d9   :  { %v3535_v48 = vpop.f32.mrf.mxu1 }
0x18da   :  { %v2805_v50 = vmul.f32 0.15176146, %v2801_v46 }
0x18dc   :  { %v2806_v52 = vsub.f32 %v2804_v49, %v2805_v50 }
0x18de   :  { %v2809_v53 = vadd.f32 %v3085_v51, %v2806_v52 }
0x18e0   :  { %v2810_v54 = vsel %vm3834_vm3, %v4162_v23, %v2809_v53 }
0x18e1   :  { %3536 = vmatprep.subr.mxu0 %v2810_v54  ;;  %v2986_v62 = vmul.f32 1.0059872, %v2810_v54 }
0x18e2   :  { %3537 = vmatpush3.msra.mxu0 %v2810_v54 }
0x18e3   :  { %3539 = vmatmul.mubr.msk.f32.vlgmr.msra.gmra.mxu0 %vm75_vm0, %v4170_v25 }
0x18e4   :  { %3541 = vmatprep.mubr.msk.f32.mxu0 %vm75_vm0, %v4177_v26 }
0x18e7   :  { %3542 = vmatmul.mubr.msk.f32.gmra.mxu0 %vm75_vm0, %v4184_v27 }
0x19a3   :  { %v3540_v6 = vpop.f32.mrf.mxu0 }
0x19a4   :  { %v2899_v60 = vadd.f32 %v3540_v6, %v2817_v56 }
0x19a5   :  { %v2893_v11 = vpop.f32.mrf.mxu0 }
0x19a6   :  { %v2894_v25 = vadd.f32 %v2893_v11, %v2813_v58 }
0x19a7   :  { %v3543_v55 = vpop.f32.mrf.mxu0 }
0x19a8   :  { %v2909_v7 = vadd.f32 %v3543_v55, %v2825_v10 }
0x19a9   :  { %v2903_v57 = vpop.f32.mrf.mxu0 }
0x19aa   :  { %3726 = vtanh.f32 %v2909_v7  ;;  %v2904_v59 = vadd.f32 %v2903_v57, %v2821_v5 }
0x19ac   :  { %3728 = vtanh.f32 %v2904_v59 }
0x19ad   :  { %3730 = vtanh.f32 %v2899_v60 }
0x19ae   :  { %3732 = vtanh.f32 %v2894_v25 }
0x19b7   :  { %v3727_v26 = vpop.eup %3726 }
0x19b8   :  { %3545 = vmatpush3.msra.mxu1 %v3727_v26 }
0x19b9   :  { %v3729_v14 = vpop.eup %3728  ;;  %3546 = vmatprep.subr.mxu1 %v3745_v17 }
0x19ba   :  { %3547 = vmatpush3.msra.mxu1 %v3729_v14  ;;  %v3731_v27 = vpop.eup %3730 }
0x19bb   :  { %3548 = vmatprep.subr.mxu1 %v3745_v17  ;;  %v3733_v61 = vpop.eup %3732 }
0x19bc   :  { %3549 = vmatpush3.msra.mxu1 %v3731_v27 }
0x19bd   :  { %3550 = vmatprep.subr.mxu1 %v3745_v17 }
0x19be   :  { %3551 = vmatpush3.msra.mxu1 %v3733_v61 }
0x19bf   :  { %3553 = vmatmul.mubr.msk.f32.vlgmr.msra.gmra.mxu1 %vm182_vm5, %v4201_v47 }
0x1a7f   :  { %v2982_v15 = vpop.f32.mrf.mxu1 }
0x1a80   :  { %v2983_v16 = vadd.f32 %v2982_v15, %v3890_v38 }
0x1a81   :  { %v3554_v1 = vpop.f32.mrf.mxu1 }
0x1a82   :  { %v2987_v63 = vmul.f32 0.10959106, %v2983_v16 }
0x1a84   :  { %v2988_v4 = vsub.f32 %v2986_v62, %v2987_v63 }
0x1a86   :  { %v2989_v8 = vsel %vm3834_vm3, %v4162_v23, %v2988_v4 }
0x1a87   :  { %2991 = vst.msk [vmem:[%s4353_s6] sm:$0xff] %vm2990_vm6, %v2989_v8 }

</bundles_post_ra>
